<compile_context>
chip_gen: v5e
topology: v5e:2x2
jax: 0.10.0
libtpu: 0.0.40
codegen_flags: <defaults>
</compile_context>

<pallas_src>
import functools

import jax
import jax.numpy as jnp
from jax.experimental import pallas as pl
from jax.experimental.pallas import tpu as pltpu

BN_EPS = 1e-5


def _dense_block_kernel(L, C0, G, C4, H, W,
                        x_ref, mask_ref, bn_ref, w1_ref, w2_ref,
                        out_ref, slab_ref):
    """Fused DenseBlock for one block of batch elements.

    x_ref    : (C0, lanes)       input features, channel-first, batch*HW lanes
    mask_ref : (8, lanes)        precomputed boundary masks (non-center taps)
    bn_ref   : (R, 1)            per layer [s1(cin), t1(cin), s2(C4), t2(C4)]
    w1_ref   : (L*C4, Cin_max)   stacked w1.T, zero-padded columns
    w2_ref   : (L*9*G, C4)       stacked per-tap 3x3 weights (dh outer, dw in)
    out_ref  : (C0 + L*G, lanes)
    slab_ref : (C_pad, lanes)    f32 scratch holding the concatenated slab
    """
    C_final = C0 + L * G
    lanes = x_ref.shape[1]

    # Input channels are the first C0 rows of the concatenated slab (f32).
    slab_ref[:C0, :] = x_ref[...].astype(jnp.float32)

    # Tap table: lane offset + boundary mask, dh outer / dw inner — this
    # ordering must match the (kh, kw) row-major flattening of conv2 weights
    # used in the wrapper (w2.reshape(9, C4, G)).  Masks also zero every
    # lane that the cyclic roll wraps around (wrapped lanes always fail the
    # row/col bound check), so roll + mask is exact.
    masks = mask_ref[...]                      # (8, lanes), loaded once
    taps = []
    mi = 0
    for dh in (-1, 0, 1):
        for dw in (-1, 0, 1):
            off = dh * W + dw
            if dh == 0 and dw == 0:
                taps.append((off, None))
            else:
                taps.append((off, masks[mi:mi + 1, :]))
                mi += 1

    bn_off = 0
    cin = C0
    for l in range(L):
        # Static slices of the packed parameter slabs (BN already folded).
        s1 = bn_ref[bn_off:bn_off + cin, :]
        t1 = bn_ref[bn_off + cin:bn_off + 2 * cin, :]
        s2 = bn_ref[bn_off + 2 * cin:bn_off + 2 * cin + C4, :]
        t2 = bn_ref[bn_off + 2 * cin + C4:bn_off + 2 * cin + 2 * C4, :]
        bn_off += 2 * (cin + C4)
        w1 = w1_ref[l * C4:(l + 1) * C4, :cin]          # (C4, cin)
        w2 = w2_ref[l * 9 * G:(l + 1) * 9 * G, :]       # (9*G, C4)

        # Stage 1: BN1 -> ReLU -> 1x1 conv (slab matmul) -> BN2 -> ReLU.
        feat = slab_ref[:cin, :]                         # (cin, lanes) f32
        h1 = jnp.maximum(feat * s1 + t1, 0.0)
        mid = jnp.dot(w1, h1, preferred_element_type=jnp.float32)  # (C4,lanes)
        mid = jnp.maximum(mid * s2 + t2, 0.0)

        # Stage 2: 3x3 conv (padding=1), matmul-first: per-tap contributions
        # at unshifted pixels, then XLU lane roll + boundary mask + sum.
        p = jnp.dot(w2, mid, preferred_element_type=jnp.float32)   # (9G,lanes)
        new = None
        for i, (off, mask) in enumerate(taps):
            tap = p[i * G:(i + 1) * G, :]                # (G, lanes)
            if off != 0:
                # want tap'[:, q] = tap[:, q + off]  ==  roll by (-off) mod n
                tap = pltpu.roll(tap, (-off) % lanes, axis=1)
            if mask is not None:
                tap = tap * mask
            new = tap if new is None else new + tap

        # Dropout (eval mode) is the identity.
        slab_ref[cin:cin + G, :] = new
        cin += G

    # Single clean output store per grid step.
    out_ref[...] = slab_ref[:C_final, :].astype(out_ref.dtype)


def _pick_block_batch(n, hw, min_lanes=512, max_lanes=4096):
    """Batch elements per grid step: >=512 lanes when possible, cap VMEM."""
    if hw % 128 != 0:
        return n            # full fold => lane block == full dim, always legal
    best = 1
    for bt in range(1, n + 1):
        if n % bt:
            continue
        lanes = bt * hw
        if lanes > max_lanes and bt != 1:
            break
        best = bt
        if lanes >= min_lanes:
            break
    return best


def dense_block_forward(x_nchw, layer_params, *, block_batch=None):
    """DenseBlock forward: x (N, C, H, W) -> (N, C + L*G, H, W)."""
    N, C0, H, W = x_nchw.shape
    HW = H * W
    L = len(layer_params)
    C4 = layer_params[0][4].shape[1]
    G = layer_params[0][9].shape[3]
    C_final = C0 + L * G
    C_pad = -(-C_final // 8) * 8
    Cin_max = C0 + (L - 1) * G

    Bt = block_batch if block_batch is not None else _pick_block_batch(N, HW)
    assert N % Bt == 0
    lanes = Bt * HW

    # Channel-first layout with (batch * spatial) on the lane axis.
    x_flat = x_nchw.transpose(1, 0, 2, 3).reshape(C0, N * HW)

    # Precomputed boundary masks for the 8 non-center taps (per-lane, depends
    # only on lane % HW, so identical for every grid step).
    q = jnp.arange(lanes, dtype=jnp.int32) % HW
    row, col = q // W, q % W
    mask_rows = []
    for dh in (-1, 0, 1):
        for dw in (-1, 0, 1):
            if dh == 0 and dw == 0:
                continue
            ok = ((row + dh >= 0) & (row + dh < H) &
                  (col + dw >= 0) & (col + dw < W))
            mask_rows.append(ok)
    tap_mask = jnp.stack(mask_rows).astype(jnp.float32)           # (8, lanes)

    # Fold BN params and pack all per-layer parameters into 3 slabs
    # (one DMA each instead of 6 per layer).
    bn_parts, w1_parts, w2_parts = [], [], []
    cin = C0
    for p in layer_params:
        g1, b1, m1, v1, w1, g2, b2, m2, v2, w2 = p
        inv1 = g1 * jax.lax.rsqrt(v1 + BN_EPS)
        inv2 = g2 * jax.lax.rsqrt(v2 + BN_EPS)
        bn_parts += [inv1, b1 - m1 * inv1, inv2, b2 - m2 * inv2]
        w1_parts.append(jnp.pad(w1.T, ((0, 0), (0, Cin_max - cin))))
        # (3,3,C4,G) -> (9,C4,G) -> (9,G,C4) -> (9G,C4); the (kh,kw) row-major
        # flattening matches the kernel tap order (dh outer, dw inner).
        w2_parts.append(
            jnp.transpose(w2.reshape(9, C4, G), (0, 2, 1)).reshape(9 * G, C4))
        cin += G
    bn_slab = jnp.concatenate(bn_parts).reshape(-1, 1).astype(jnp.float32)
    w1_slab = jnp.concatenate(w1_parts, axis=0).astype(jnp.float32)
    w2_slab = jnp.concatenate(w2_parts, axis=0).astype(jnp.float32)

    kernel = functools.partial(_dense_block_kernel, L, C0, G, C4, H, W)
    out_flat = pl.pallas_call(
        kernel,
        out_shape=jax.ShapeDtypeStruct((C_final, N * HW), x_nchw.dtype),
        grid=(N // Bt,),
        in_specs=[
            pl.BlockSpec((C0, lanes), lambda g: (0, g)),
            pl.BlockSpec(tap_mask.shape, lambda g: (0, 0)),
            pl.BlockSpec(bn_slab.shape, lambda g: (0, 0)),
            pl.BlockSpec(w1_slab.shape, lambda g: (0, 0)),
            pl.BlockSpec(w2_slab.shape, lambda g: (0, 0)),
        ],
        out_specs=pl.BlockSpec((C_final, lanes), lambda g: (0, g)),
        scratch_shapes=[pltpu.VMEM((C_pad, lanes), jnp.float32)],
        compiler_params=pltpu.CompilerParams(
            dimension_semantics=("parallel",)),
    )(x_flat, tap_mask, bn_slab, w1_slab, w2_slab)

    return out_flat.reshape(C_final, N, H, W).transpose(1, 0, 2, 3)


# ----------------------------------------------------------------------------
# Parameter init (deterministic, synthetic) and pure-JAX reference.
# ----------------------------------------------------------------------------
def init_bottleneck_params(key, in_channels, growth_rate, dtype=jnp.float32):
    c4 = 4 * growth_rate
    ks = jax.random.split(key, 10)
    g1 = jax.random.uniform(ks[0], (in_channels,), dtype, 0.5, 1.5)
    b1 = 0.1 * jax.random.normal(ks[1], (in_channels,), dtype)
    m1 = 0.1 * jax.random.normal(ks[2], (in_channels,), dtype)
    v1 = jax.random.uniform(ks[3], (in_channels,), dtype, 0.5, 1.5)
    w1 = jax.random.normal(ks[4], (in_channels, c4), dtype) / jnp.sqrt(
        jnp.asarray(in_channels, dtype))
    g2 = jax.random.uniform(ks[5], (c4,), dtype, 0.5, 1.5)
    b2 = 0.1 * jax.random.normal(ks[6], (c4,), dtype)
    m2 = 0.1 * jax.random.normal(ks[7], (c4,), dtype)
    v2 = jax.random.uniform(ks[8], (c4,), dtype, 0.5, 1.5)
    w2 = jax.random.normal(ks[9], (3, 3, c4, growth_rate), dtype) / jnp.sqrt(
        jnp.asarray(9 * c4, dtype))
    return (g1, b1, m1, v1, w1, g2, b2, m2, v2, w2)


def _bottleneck_ref(x_nhwc, params):
    g1, b1, m1, v1, w1, g2, b2, m2, v2, w2 = params
    h = (x_nhwc - m1) * (g1 * jax.lax.rsqrt(v1 + BN_EPS)) + b1
    h = jnp.maximum(h, 0.0)
    h = jnp.einsum('nhwc,cd->nhwd', h, w1)
    h = (h - m2) * (g2 * jax.lax.rsqrt(v2 + BN_EPS)) + b2
    h = jnp.maximum(h, 0.0)
    return jax.lax.conv_general_dilated(
        h, w2, window_strides=(1, 1), padding='SAME',
        dimension_numbers=('NHWC', 'HWIO', 'NHWC'))


def dense_block_ref(x_nchw, layer_params):
    x = jnp.transpose(x_nchw, (0, 2, 3, 1))
    for params in layer_params:
        x = jnp.concatenate([x, _bottleneck_ref(x, params)], axis=-1)
    return jnp.transpose(x, (0, 3, 1, 2))


if __name__ == "__main__":
    key = jax.random.PRNGKey(0)
    N, C, H, W = 2, 4, 16, 16
    num_layers, growth_rate = 3, 4

    kx, kp = jax.random.split(key)
    x_nchw = jax.random.normal(kx, (N, C, H, W), jnp.float32)

    layer_keys = jax.random.split(kp, num_layers)
    layer_params = [
        init_bottleneck_params(layer_keys[i], C + i * growth_rate, growth_rate)
        for i in range(num_layers)
    ]

    out = dense_block_forward(x_nchw, layer_params)
    out = jax.block_until_ready(out)

    expected_channels = C + num_layers * growth_rate
    assert out.shape == (N, expected_channels, H, W), out.shape

    ref = dense_block_ref(x_nchw, layer_params)
    assert jnp.allclose(out, ref, atol=1e-3, rtol=1e-3), (
        float(jnp.max(jnp.abs(out - ref))))

    print("KERNEL_OK")
</pallas_src>

<mosaic_0001>
module attributes {stable_mosaic.version = 11 : i64} {
  func.func @_dense_block_kernel(%arg0: i32, %arg1: memref<4x512xf32, #tpu.memory_space<vmem>>, %arg2: memref<8x512xf32, #tpu.memory_space<vmem>>, %arg3: memref<144x1xf32, #tpu.memory_space<vmem>>, %arg4: memref<48x12xf32, #tpu.memory_space<vmem>>, %arg5: memref<108x16xf32, #tpu.memory_space<vmem>>, %arg6: memref<16x512xf32, #tpu.memory_space<vmem>>, %arg7: memref<16x512xf32, #tpu.memory_space<vmem>>) attributes {dimension_semantics = [#tpu.dimension_semantics<parallel>], iteration_bounds = array<i64: 1>, scalar_prefetch = 0 : i64, scratch_operands = 1 : i64, tpu.core_type = #tpu.core_type<tc>, window_params = [{transform_indices = @transform_0, window_bounds = array<i64: 4, 512>}, {pipeline_mode = #tpu.pipeline_mode<synchronous>, transform_indices = @transform_1, window_bounds = array<i64: 8, 512>}, {pipeline_mode = #tpu.pipeline_mode<synchronous>, transform_indices = @transform_2, window_bounds = array<i64: 144, 1>}, {pipeline_mode = #tpu.pipeline_mode<synchronous>, transform_indices = @transform_3, window_bounds = array<i64: 48, 12>}, {pipeline_mode = #tpu.pipeline_mode<synchronous>, transform_indices = @transform_4, window_bounds = array<i64: 108, 16>}, {transform_indices = @transform_5, window_bounds = array<i64: 16, 512>}]} {
    %c0 = arith.constant 0 : index
    %c0_0 = arith.constant 0 : index
    %0 = vector.load %arg1[%c0, %c0_0] : memref<4x512xf32, #tpu.memory_space<vmem>>, vector<4x512xf32>
    %c0_1 = arith.constant 0 : index
    %c0_2 = arith.constant 0 : index
    %1 = vector.load %arg7[%c0_1, %c0_2] : memref<16x512xf32, #tpu.memory_space<vmem>>, vector<4x512xf32>
    tpu.vector_store %arg7[%c0_1, %c0_2], %0 {strides = array<i32>} : memref<16x512xf32, #tpu.memory_space<vmem>>, vector<4x512xf32>,
    %c0_3 = arith.constant 0 : index
    %c0_4 = arith.constant 0 : index
    %2 = vector.load %arg2[%c0_3, %c0_4] : memref<8x512xf32, #tpu.memory_space<vmem>>, vector<8x512xf32>
    %3 = vector.extract_strided_slice %2 {offsets = [0, 0], sizes = [1, 512], strides = [1, 1]} : vector<8x512xf32> to vector<1x512xf32>
    %4 = vector.extract_strided_slice %2 {offsets = [1, 0], sizes = [1, 512], strides = [1, 1]} : vector<8x512xf32> to vector<1x512xf32>
    %5 = vector.extract_strided_slice %2 {offsets = [2, 0], sizes = [1, 512], strides = [1, 1]} : vector<8x512xf32> to vector<1x512xf32>
    %6 = vector.extract_strided_slice %2 {offsets = [3, 0], sizes = [1, 512], strides = [1, 1]} : vector<8x512xf32> to vector<1x512xf32>
    %7 = vector.extract_strided_slice %2 {offsets = [4, 0], sizes = [1, 512], strides = [1, 1]} : vector<8x512xf32> to vector<1x512xf32>
    %8 = vector.extract_strided_slice %2 {offsets = [5, 0], sizes = [1, 512], strides = [1, 1]} : vector<8x512xf32> to vector<1x512xf32>
    %9 = vector.extract_strided_slice %2 {offsets = [6, 0], sizes = [1, 512], strides = [1, 1]} : vector<8x512xf32> to vector<1x512xf32>
    %10 = vector.extract_strided_slice %2 {offsets = [7, 0], sizes = [1, 512], strides = [1, 1]} : vector<8x512xf32> to vector<1x512xf32>
    %c0_5 = arith.constant 0 : index
    %c0_6 = arith.constant 0 : index
    %11 = vector.load %arg3[%c0_5, %c0_6] : memref<144x1xf32, #tpu.memory_space<vmem>>, vector<4x1xf32>
    %c4 = arith.constant 4 : index
    %c0_7 = arith.constant 0 : index
    %12 = vector.load %arg3[%c4, %c0_7] : memref<144x1xf32, #tpu.memory_space<vmem>>, vector<4x1xf32>
    %c8 = arith.constant 8 : index
    %c0_8 = arith.constant 0 : index
    %13 = vector.load %arg3[%c8, %c0_8] : memref<144x1xf32, #tpu.memory_space<vmem>>, vector<16x1xf32>
    %c24 = arith.constant 24 : index
    %c0_9 = arith.constant 0 : index
    %14 = vector.load %arg3[%c24, %c0_9] : memref<144x1xf32, #tpu.memory_space<vmem>>, vector<16x1xf32>
    %c0_10 = arith.constant 0 : index
    %c0_11 = arith.constant 0 : index
    %15 = vector.load %arg4[%c0_10, %c0_11] : memref<48x12xf32, #tpu.memory_space<vmem>>, vector<16x4xf32>
    %c0_12 = arith.constant 0 : index
    %c0_13 = arith.constant 0 : index
    %16 = vector.load %arg5[%c0_12, %c0_13] : memref<108x16xf32, #tpu.memory_space<vmem>>, vector<36x16xf32>
    %c0_14 = arith.constant 0 : index
    %c0_15 = arith.constant 0 : index
    %17 = vector.load %arg7[%c0_14, %c0_15] : memref<16x512xf32, #tpu.memory_space<vmem>>, vector<4x512xf32>
    %18 = vector.broadcast %11 : vector<4x1xf32> to vector<4x512xf32>
    %19 = arith.mulf %17, %18 : vector<4x512xf32>
    %20 = vector.broadcast %12 : vector<4x1xf32> to vector<4x512xf32>
    %21 = arith.addf %19, %20 : vector<4x512xf32>
    %cst = arith.constant 0.000000e+00 : f32
    %22 = vector.broadcast %cst : f32 to vector<4x512xf32>
    %23 = arith.maximumf %21, %22 : vector<4x512xf32>
    %cst_16 = arith.constant dense<0.000000e+00> : vector<16x512xf32>
    %24 = tpu.matmul %15, %23, %cst_16 {dimension_numbers = #tpu.dot_dimension_numbers<[1], [0], [0], [1], [0, 0, 1, 1], [], []>} : vector<16x4xf32>, vector<4x512xf32>, vector<16x512xf32> -> vector<16x512xf32>
    %25 = vector.broadcast %13 : vector<16x1xf32> to vector<16x512xf32>
    %26 = arith.mulf %24, %25 : vector<16x512xf32>
    %27 = vector.broadcast %14 : vector<16x1xf32> to vector<16x512xf32>
    %28 = arith.addf %26, %27 : vector<16x512xf32>
    %cst_17 = arith.constant 0.000000e+00 : f32
    %29 = vector.broadcast %cst_17 : f32 to vector<16x512xf32>
    %30 = arith.maximumf %28, %29 : vector<16x512xf32>
    %cst_18 = arith.constant dense<0.000000e+00> : vector<36x512xf32>
    %31 = tpu.matmul %16, %30, %cst_18 {dimension_numbers = #tpu.dot_dimension_numbers<[1], [0], [0], [1], [0, 0, 1, 1], [], []>} : vector<36x16xf32>, vector<16x512xf32>, vector<36x512xf32> -> vector<36x512xf32>
    %32 = vector.extract_strided_slice %31 {offsets = [0, 0], sizes = [4, 512], strides = [1, 1]} : vector<36x512xf32> to vector<4x512xf32>
    %c17_i32 = arith.constant 17 : i32
    %33 = tpu.dynamic_rotate %32 by %c17_i32 dim 1 : vector<4x512xf32>, i32 -> vector<4x512xf32>
    %34 = vector.broadcast %3 : vector<1x512xf32> to vector<4x512xf32>
    %35 = arith.mulf %33, %34 : vector<4x512xf32>
    %36 = vector.extract_strided_slice %31 {offsets = [4, 0], sizes = [4, 512], strides = [1, 1]} : vector<36x512xf32> to vector<4x512xf32>
    %c16_i32 = arith.constant 16 : i32
    %37 = tpu.dynamic_rotate %36 by %c16_i32 dim 1 : vector<4x512xf32>, i32 -> vector<4x512xf32>
    %38 = vector.broadcast %4 : vector<1x512xf32> to vector<4x512xf32>
    %39 = arith.mulf %37, %38 : vector<4x512xf32>
    %40 = arith.addf %35, %39 : vector<4x512xf32>
    %41 = vector.extract_strided_slice %31 {offsets = [8, 0], sizes = [4, 512], strides = [1, 1]} : vector<36x512xf32> to vector<4x512xf32>
    %c15_i32 = arith.constant 15 : i32
    %42 = tpu.dynamic_rotate %41 by %c15_i32 dim 1 : vector<4x512xf32>, i32 -> vector<4x512xf32>
    %43 = vector.broadcast %5 : vector<1x512xf32> to vector<4x512xf32>
    %44 = arith.mulf %42, %43 : vector<4x512xf32>
    %45 = arith.addf %40, %44 : vector<4x512xf32>
    %46 = vector.extract_strided_slice %31 {offsets = [12, 0], sizes = [4, 512], strides = [1, 1]} : vector<36x512xf32> to vector<4x512xf32>
    %c1_i32 = arith.constant 1 : i32
    %47 = tpu.dynamic_rotate %46 by %c1_i32 dim 1 : vector<4x512xf32>, i32 -> vector<4x512xf32>
    %48 = vector.broadcast %6 : vector<1x512xf32> to vector<4x512xf32>
    %49 = arith.mulf %47, %48 : vector<4x512xf32>
    %50 = arith.addf %45, %49 : vector<4x512xf32>
    %51 = vector.extract_strided_slice %31 {offsets = [16, 0], sizes = [4, 512], strides = [1, 1]} : vector<36x512xf32> to vector<4x512xf32>
    %52 = arith.addf %50, %51 : vector<4x512xf32>
    %53 = vector.extract_strided_slice %31 {offsets = [20, 0], sizes = [4, 512], strides = [1, 1]} : vector<36x512xf32> to vector<4x512xf32>
    %c511_i32 = arith.constant 511 : i32
    %54 = tpu.dynamic_rotate %53 by %c511_i32 dim 1 : vector<4x512xf32>, i32 -> vector<4x512xf32>
    %55 = vector.broadcast %7 : vector<1x512xf32> to vector<4x512xf32>
    %56 = arith.mulf %54, %55 : vector<4x512xf32>
    %57 = arith.addf %52, %56 : vector<4x512xf32>
    %58 = vector.extract_strided_slice %31 {offsets = [24, 0], sizes = [4, 512], strides = [1, 1]} : vector<36x512xf32> to vector<4x512xf32>
    %c497_i32 = arith.constant 497 : i32
    %59 = tpu.dynamic_rotate %58 by %c497_i32 dim 1 : vector<4x512xf32>, i32 -> vector<4x512xf32>
    %60 = vector.broadcast %8 : vector<1x512xf32> to vector<4x512xf32>
    %61 = arith.mulf %59, %60 : vector<4x512xf32>
    %62 = arith.addf %57, %61 : vector<4x512xf32>
    %63 = vector.extract_strided_slice %31 {offsets = [28, 0], sizes = [4, 512], strides = [1, 1]} : vector<36x512xf32> to vector<4x512xf32>
    %c496_i32 = arith.constant 496 : i32
    %64 = tpu.dynamic_rotate %63 by %c496_i32 dim 1 : vector<4x512xf32>, i32 -> vector<4x512xf32>
    %65 = vector.broadcast %9 : vector<1x512xf32> to vector<4x512xf32>
    %66 = arith.mulf %64, %65 : vector<4x512xf32>
    %67 = arith.addf %62, %66 : vector<4x512xf32>
    %68 = vector.extract_strided_slice %31 {offsets = [32, 0], sizes = [4, 512], strides = [1, 1]} : vector<36x512xf32> to vector<4x512xf32>
    %c495_i32 = arith.constant 495 : i32
    %69 = tpu.dynamic_rotate %68 by %c495_i32 dim 1 : vector<4x512xf32>, i32 -> vector<4x512xf32>
    %70 = vector.broadcast %10 : vector<1x512xf32> to vector<4x512xf32>
    %71 = arith.mulf %69, %70 : vector<4x512xf32>
    %72 = arith.addf %67, %71 : vector<4x512xf32>
    %c4_19 = arith.constant 4 : index
    %c0_20 = arith.constant 0 : index
    %73 = vector.load %arg7[%c4_19, %c0_20] : memref<16x512xf32, #tpu.memory_space<vmem>>, vector<4x512xf32>
    tpu.vector_store %arg7[%c4_19, %c0_20], %72 {strides = array<i32>} : memref<16x512xf32, #tpu.memory_space<vmem>>, vector<4x512xf32>,
    %c40 = arith.constant 40 : index
    %c0_21 = arith.constant 0 : index
    %74 = vector.load %arg3[%c40, %c0_21] : memref<144x1xf32, #tpu.memory_space<vmem>>, vector<8x1xf32>
    %c48 = arith.constant 48 : index
    %c0_22 = arith.constant 0 : index
    %75 = vector.load %arg3[%c48, %c0_22] : memref<144x1xf32, #tpu.memory_space<vmem>>, vector<8x1xf32>
    %c56 = arith.constant 56 : index
    %c0_23 = arith.constant 0 : index
    %76 = vector.load %arg3[%c56, %c0_23] : memref<144x1xf32, #tpu.memory_space<vmem>>, vector<16x1xf32>
    %c72 = arith.constant 72 : index
    %c0_24 = arith.constant 0 : index
    %77 = vector.load %arg3[%c72, %c0_24] : memref<144x1xf32, #tpu.memory_space<vmem>>, vector<16x1xf32>
    %c16 = arith.constant 16 : index
    %c0_25 = arith.constant 0 : index
    %78 = vector.load %arg4[%c16, %c0_25] : memref<48x12xf32, #tpu.memory_space<vmem>>, vector<16x8xf32>
    %c36 = arith.constant 36 : index
    %c0_26 = arith.constant 0 : index
    %79 = vector.load %arg5[%c36, %c0_26] : memref<108x16xf32, #tpu.memory_space<vmem>>, vector<36x16xf32>
    %c0_27 = arith.constant 0 : index
    %c0_28 = arith.constant 0 : index
    %80 = vector.load %arg7[%c0_27, %c0_28] : memref<16x512xf32, #tpu.memory_space<vmem>>, vector<8x512xf32>
    %81 = vector.broadcast %74 : vector<8x1xf32> to vector<8x512xf32>
    %82 = arith.mulf %80, %81 : vector<8x512xf32>
    %83 = vector.broadcast %75 : vector<8x1xf32> to vector<8x512xf32>
    %84 = arith.addf %82, %83 : vector<8x512xf32>
    %cst_29 = arith.constant 0.000000e+00 : f32
    %85 = vector.broadcast %cst_29 : f32 to vector<8x512xf32>
    %86 = arith.maximumf %84, %85 : vector<8x512xf32>
    %cst_30 = arith.constant dense<0.000000e+00> : vector<16x512xf32>
    %87 = tpu.matmul %78, %86, %cst_30 {dimension_numbers = #tpu.dot_dimension_numbers<[1], [0], [0], [1], [0, 0, 1, 1], [], []>} : vector<16x8xf32>, vector<8x512xf32>, vector<16x512xf32> -> vector<16x512xf32>
    %88 = vector.broadcast %76 : vector<16x1xf32> to vector<16x512xf32>
    %89 = arith.mulf %87, %88 : vector<16x512xf32>
    %90 = vector.broadcast %77 : vector<16x1xf32> to vector<16x512xf32>
    %91 = arith.addf %89, %90 : vector<16x512xf32>
    %cst_31 = arith.constant 0.000000e+00 : f32
    %92 = vector.broadcast %cst_31 : f32 to vector<16x512xf32>
    %93 = arith.maximumf %91, %92 : vector<16x512xf32>
    %cst_32 = arith.constant dense<0.000000e+00> : vector<36x512xf32>
    %94 = tpu.matmul %79, %93, %cst_32 {dimension_numbers = #tpu.dot_dimension_numbers<[1], [0], [0], [1], [0, 0, 1, 1], [], []>} : vector<36x16xf32>, vector<16x512xf32>, vector<36x512xf32> -> vector<36x512xf32>
    %95 = vector.extract_strided_slice %94 {offsets = [0, 0], sizes = [4, 512], strides = [1, 1]} : vector<36x512xf32> to vector<4x512xf32>
    %c17_i32_33 = arith.constant 17 : i32
    %96 = tpu.dynamic_rotate %95 by %c17_i32_33 dim 1 : vector<4x512xf32>, i32 -> vector<4x512xf32>
    %97 = vector.broadcast %3 : vector<1x512xf32> to vector<4x512xf32>
    %98 = arith.mulf %96, %97 : vector<4x512xf32>
    %99 = vector.extract_strided_slice %94 {offsets = [4, 0], sizes = [4, 512], strides = [1, 1]} : vector<36x512xf32> to vector<4x512xf32>
    %c16_i32_34 = arith.constant 16 : i32
    %100 = tpu.dynamic_rotate %99 by %c16_i32_34 dim 1 : vector<4x512xf32>, i32 -> vector<4x512xf32>
    %101 = vector.broadcast %4 : vector<1x512xf32> to vector<4x512xf32>
    %102 = arith.mulf %100, %101 : vector<4x512xf32>
    %103 = arith.addf %98, %102 : vector<4x512xf32>
    %104 = vector.extract_strided_slice %94 {offsets = [8, 0], sizes = [4, 512], strides = [1, 1]} : vector<36x512xf32> to vector<4x512xf32>
    %c15_i32_35 = arith.constant 15 : i32
    %105 = tpu.dynamic_rotate %104 by %c15_i32_35 dim 1 : vector<4x512xf32>, i32 -> vector<4x512xf32>
    %106 = vector.broadcast %5 : vector<1x512xf32> to vector<4x512xf32>
    %107 = arith.mulf %105, %106 : vector<4x512xf32>
    %108 = arith.addf %103, %107 : vector<4x512xf32>
    %109 = vector.extract_strided_slice %94 {offsets = [12, 0], sizes = [4, 512], strides = [1, 1]} : vector<36x512xf32> to vector<4x512xf32>
    %c1_i32_36 = arith.constant 1 : i32
    %110 = tpu.dynamic_rotate %109 by %c1_i32_36 dim 1 : vector<4x512xf32>, i32 -> vector<4x512xf32>
    %111 = vector.broadcast %6 : vector<1x512xf32> to vector<4x512xf32>
    %112 = arith.mulf %110, %111 : vector<4x512xf32>
    %113 = arith.addf %108, %112 : vector<4x512xf32>
    %114 = vector.extract_strided_slice %94 {offsets = [16, 0], sizes = [4, 512], strides = [1, 1]} : vector<36x512xf32> to vector<4x512xf32>
    %115 = arith.addf %113, %114 : vector<4x512xf32>
    %116 = vector.extract_strided_slice %94 {offsets = [20, 0], sizes = [4, 512], strides = [1, 1]} : vector<36x512xf32> to vector<4x512xf32>
    %c511_i32_37 = arith.constant 511 : i32
    %117 = tpu.dynamic_rotate %116 by %c511_i32_37 dim 1 : vector<4x512xf32>, i32 -> vector<4x512xf32>
    %118 = vector.broadcast %7 : vector<1x512xf32> to vector<4x512xf32>
    %119 = arith.mulf %117, %118 : vector<4x512xf32>
    %120 = arith.addf %115, %119 : vector<4x512xf32>
    %121 = vector.extract_strided_slice %94 {offsets = [24, 0], sizes = [4, 512], strides = [1, 1]} : vector<36x512xf32> to vector<4x512xf32>
    %c497_i32_38 = arith.constant 497 : i32
    %122 = tpu.dynamic_rotate %121 by %c497_i32_38 dim 1 : vector<4x512xf32>, i32 -> vector<4x512xf32>
    %123 = vector.broadcast %8 : vector<1x512xf32> to vector<4x512xf32>
    %124 = arith.mulf %122, %123 : vector<4x512xf32>
    %125 = arith.addf %120, %124 : vector<4x512xf32>
    %126 = vector.extract_strided_slice %94 {offsets = [28, 0], sizes = [4, 512], strides = [1, 1]} : vector<36x512xf32> to vector<4x512xf32>
    %c496_i32_39 = arith.constant 496 : i32
    %127 = tpu.dynamic_rotate %126 by %c496_i32_39 dim 1 : vector<4x512xf32>, i32 -> vector<4x512xf32>
    %128 = vector.broadcast %9 : vector<1x512xf32> to vector<4x512xf32>
    %129 = arith.mulf %127, %128 : vector<4x512xf32>
    %130 = arith.addf %125, %129 : vector<4x512xf32>
    %131 = vector.extract_strided_slice %94 {offsets = [32, 0], sizes = [4, 512], strides = [1, 1]} : vector<36x512xf32> to vector<4x512xf32>
    %c495_i32_40 = arith.constant 495 : i32
    %132 = tpu.dynamic_rotate %131 by %c495_i32_40 dim 1 : vector<4x512xf32>, i32 -> vector<4x512xf32>
    %133 = vector.broadcast %10 : vector<1x512xf32> to vector<4x512xf32>
    %134 = arith.mulf %132, %133 : vector<4x512xf32>
    %135 = arith.addf %130, %134 : vector<4x512xf32>
    %c8_41 = arith.constant 8 : index
    %c0_42 = arith.constant 0 : index
    %136 = vector.load %arg7[%c8_41, %c0_42] : memref<16x512xf32, #tpu.memory_space<vmem>>, vector<4x512xf32>
    tpu.vector_store %arg7[%c8_41, %c0_42], %135 {strides = array<i32>} : memref<16x512xf32, #tpu.memory_space<vmem>>, vector<4x512xf32>,
    %c88 = arith.constant 88 : index
    %c0_43 = arith.constant 0 : index
    %137 = vector.load %arg3[%c88, %c0_43] : memref<144x1xf32, #tpu.memory_space<vmem>>, vector<12x1xf32>
    %c100 = arith.constant 100 : index
    %c0_44 = arith.constant 0 : index
    %138 = vector.load %arg3[%c100, %c0_44] : memref<144x1xf32, #tpu.memory_space<vmem>>, vector<12x1xf32>
    %c112 = arith.constant 112 : index
    %c0_45 = arith.constant 0 : index
    %139 = vector.load %arg3[%c112, %c0_45] : memref<144x1xf32, #tpu.memory_space<vmem>>, vector<16x1xf32>
    %c128 = arith.constant 128 : index
    %c0_46 = arith.constant 0 : index
    %140 = vector.load %arg3[%c128, %c0_46] : memref<144x1xf32, #tpu.memory_space<vmem>>, vector<16x1xf32>
    %c32 = arith.constant 32 : index
    %c0_47 = arith.constant 0 : index
    %141 = vector.load %arg4[%c32, %c0_47] : memref<48x12xf32, #tpu.memory_space<vmem>>, vector<16x12xf32>
    %c72_48 = arith.constant 72 : index
    %c0_49 = arith.constant 0 : index
    %142 = vector.load %arg5[%c72_48, %c0_49] : memref<108x16xf32, #tpu.memory_space<vmem>>, vector<36x16xf32>
    %c0_50 = arith.constant 0 : index
    %c0_51 = arith.constant 0 : index
    %143 = vector.load %arg7[%c0_50, %c0_51] : memref<16x512xf32, #tpu.memory_space<vmem>>, vector<12x512xf32>
    %144 = vector.broadcast %137 : vector<12x1xf32> to vector<12x512xf32>
    %145 = arith.mulf %143, %144 : vector<12x512xf32>
    %146 = vector.broadcast %138 : vector<12x1xf32> to vector<12x512xf32>
    %147 = arith.addf %145, %146 : vector<12x512xf32>
    %cst_52 = arith.constant 0.000000e+00 : f32
    %148 = vector.broadcast %cst_52 : f32 to vector<12x512xf32>
    %149 = arith.maximumf %147, %148 : vector<12x512xf32>
    %cst_53 = arith.constant dense<0.000000e+00> : vector<16x512xf32>
    %150 = tpu.matmul %141, %149, %cst_53 {dimension_numbers = #tpu.dot_dimension_numbers<[1], [0], [0], [1], [0, 0, 1, 1], [], []>} : vector<16x12xf32>, vector<12x512xf32>, vector<16x512xf32> -> vector<16x512xf32>
    %151 = vector.broadcast %139 : vector<16x1xf32> to vector<16x512xf32>
    %152 = arith.mulf %150, %151 : vector<16x512xf32>
    %153 = vector.broadcast %140 : vector<16x1xf32> to vector<16x512xf32>
    %154 = arith.addf %152, %153 : vector<16x512xf32>
    %cst_54 = arith.constant 0.000000e+00 : f32
    %155 = vector.broadcast %cst_54 : f32 to vector<16x512xf32>
    %156 = arith.maximumf %154, %155 : vector<16x512xf32>
    %cst_55 = arith.constant dense<0.000000e+00> : vector<36x512xf32>
    %157 = tpu.matmul %142, %156, %cst_55 {dimension_numbers = #tpu.dot_dimension_numbers<[1], [0], [0], [1], [0, 0, 1, 1], [], []>} : vector<36x16xf32>, vector<16x512xf32>, vector<36x512xf32> -> vector<36x512xf32>
    %158 = vector.extract_strided_slice %157 {offsets = [0, 0], sizes = [4, 512], strides = [1, 1]} : vector<36x512xf32> to vector<4x512xf32>
    %c17_i32_56 = arith.constant 17 : i32
    %159 = tpu.dynamic_rotate %158 by %c17_i32_56 dim 1 : vector<4x512xf32>, i32 -> vector<4x512xf32>
    %160 = vector.broadcast %3 : vector<1x512xf32> to vector<4x512xf32>
    %161 = arith.mulf %159, %160 : vector<4x512xf32>
    %162 = vector.extract_strided_slice %157 {offsets = [4, 0], sizes = [4, 512], strides = [1, 1]} : vector<36x512xf32> to vector<4x512xf32>
    %c16_i32_57 = arith.constant 16 : i32
    %163 = tpu.dynamic_rotate %162 by %c16_i32_57 dim 1 : vector<4x512xf32>, i32 -> vector<4x512xf32>
    %164 = vector.broadcast %4 : vector<1x512xf32> to vector<4x512xf32>
    %165 = arith.mulf %163, %164 : vector<4x512xf32>
    %166 = arith.addf %161, %165 : vector<4x512xf32>
    %167 = vector.extract_strided_slice %157 {offsets = [8, 0], sizes = [4, 512], strides = [1, 1]} : vector<36x512xf32> to vector<4x512xf32>
    %c15_i32_58 = arith.constant 15 : i32
    %168 = tpu.dynamic_rotate %167 by %c15_i32_58 dim 1 : vector<4x512xf32>, i32 -> vector<4x512xf32>
    %169 = vector.broadcast %5 : vector<1x512xf32> to vector<4x512xf32>
    %170 = arith.mulf %168, %169 : vector<4x512xf32>
    %171 = arith.addf %166, %170 : vector<4x512xf32>
    %172 = vector.extract_strided_slice %157 {offsets = [12, 0], sizes = [4, 512], strides = [1, 1]} : vector<36x512xf32> to vector<4x512xf32>
    %c1_i32_59 = arith.constant 1 : i32
    %173 = tpu.dynamic_rotate %172 by %c1_i32_59 dim 1 : vector<4x512xf32>, i32 -> vector<4x512xf32>
    %174 = vector.broadcast %6 : vector<1x512xf32> to vector<4x512xf32>
    %175 = arith.mulf %173, %174 : vector<4x512xf32>
    %176 = arith.addf %171, %175 : vector<4x512xf32>
    %177 = vector.extract_strided_slice %157 {offsets = [16, 0], sizes = [4, 512], strides = [1, 1]} : vector<36x512xf32> to vector<4x512xf32>
    %178 = arith.addf %176, %177 : vector<4x512xf32>
    %179 = vector.extract_strided_slice %157 {offsets = [20, 0], sizes = [4, 512], strides = [1, 1]} : vector<36x512xf32> to vector<4x512xf32>
    %c511_i32_60 = arith.constant 511 : i32
    %180 = tpu.dynamic_rotate %179 by %c511_i32_60 dim 1 : vector<4x512xf32>, i32 -> vector<4x512xf32>
    %181 = vector.broadcast %7 : vector<1x512xf32> to vector<4x512xf32>
    %182 = arith.mulf %180, %181 : vector<4x512xf32>
    %183 = arith.addf %178, %182 : vector<4x512xf32>
    %184 = vector.extract_strided_slice %157 {offsets = [24, 0], sizes = [4, 512], strides = [1, 1]} : vector<36x512xf32> to vector<4x512xf32>
    %c497_i32_61 = arith.constant 497 : i32
    %185 = tpu.dynamic_rotate %184 by %c497_i32_61 dim 1 : vector<4x512xf32>, i32 -> vector<4x512xf32>
    %186 = vector.broadcast %8 : vector<1x512xf32> to vector<4x512xf32>
    %187 = arith.mulf %185, %186 : vector<4x512xf32>
    %188 = arith.addf %183, %187 : vector<4x512xf32>
    %189 = vector.extract_strided_slice %157 {offsets = [28, 0], sizes = [4, 512], strides = [1, 1]} : vector<36x512xf32> to vector<4x512xf32>
    %c496_i32_62 = arith.constant 496 : i32
    %190 = tpu.dynamic_rotate %189 by %c496_i32_62 dim 1 : vector<4x512xf32>, i32 -> vector<4x512xf32>
    %191 = vector.broadcast %9 : vector<1x512xf32> to vector<4x512xf32>
    %192 = arith.mulf %190, %191 : vector<4x512xf32>
    %193 = arith.addf %188, %192 : vector<4x512xf32>
    %194 = vector.extract_strided_slice %157 {offsets = [32, 0], sizes = [4, 512], strides = [1, 1]} : vector<36x512xf32> to vector<4x512xf32>
    %c495_i32_63 = arith.constant 495 : i32
    %195 = tpu.dynamic_rotate %194 by %c495_i32_63 dim 1 : vector<4x512xf32>, i32 -> vector<4x512xf32>
    %196 = vector.broadcast %10 : vector<1x512xf32> to vector<4x512xf32>
    %197 = arith.mulf %195, %196 : vector<4x512xf32>
    %198 = arith.addf %193, %197 : vector<4x512xf32>
    %c12 = arith.constant 12 : index
    %c0_64 = arith.constant 0 : index
    %199 = vector.load %arg7[%c12, %c0_64] : memref<16x512xf32, #tpu.memory_space<vmem>>, vector<4x512xf32>
    tpu.vector_store %arg7[%c12, %c0_64], %198 {strides = array<i32>} : memref<16x512xf32, #tpu.memory_space<vmem>>, vector<4x512xf32>,
    %c0_65 = arith.constant 0 : index
    %c0_66 = arith.constant 0 : index
    %200 = vector.load %arg7[%c0_65, %c0_66] : memref<16x512xf32, #tpu.memory_space<vmem>>, vector<16x512xf32>
    %c0_67 = arith.constant 0 : index
    %c0_68 = arith.constant 0 : index
    %201 = vector.load %arg6[%c0_67, %c0_68] : memref<16x512xf32, #tpu.memory_space<vmem>>, vector<16x512xf32>
    tpu.vector_store %arg6[%c0_67, %c0_68], %200 {strides = array<i32>} : memref<16x512xf32, #tpu.memory_space<vmem>>, vector<16x512xf32>,
    return
  }
  func.func @transform_0(%arg0: i32) -> (i32, i32) {
    %c0_i32 = arith.constant 0 : i32
    %c0_i32_0 = arith.constant 0 : i32
    return %c0_i32, %arg0 : i32, i32
  }
  func.func @transform_1(%arg0: i32) -> (i32, i32) {
    %c0_i32 = arith.constant 0 : i32
    %c0_i32_0 = arith.constant 0 : i32
    %c0_i32_1 = arith.constant 0 : i32
    return %c0_i32, %c0_i32_0 : i32, i32
  }
  func.func @transform_2(%arg0: i32) -> (i32, i32) {
    %c0_i32 = arith.constant 0 : i32
    %c0_i32_0 = arith.constant 0 : i32
    %c0_i32_1 = arith.constant 0 : i32
    return %c0_i32, %c0_i32_0 : i32, i32
  }
  func.func @transform_3(%arg0: i32) -> (i32, i32) {
    %c0_i32 = arith.constant 0 : i32
    %c0_i32_0 = arith.constant 0 : i32
    %c0_i32_1 = arith.constant 0 : i32
    return %c0_i32, %c0_i32_0 : i32, i32
  }
  func.func @transform_4(%arg0: i32) -> (i32, i32) {
    %c0_i32 = arith.constant 0 : i32
    %c0_i32_0 = arith.constant 0 : i32
    %c0_i32_1 = arith.constant 0 : i32
    return %c0_i32, %c0_i32_0 : i32, i32
  }
  func.func @transform_5(%arg0: i32) -> (i32, i32) {
    %c0_i32 = arith.constant 0 : i32
    %c0_i32_0 = arith.constant 0 : i32
    return %c0_i32, %arg0 : i32, i32
  }
}

</mosaic_0001>

<bundles_post_ra>
// kernel: tpu_custom_call.1
= control target key start
LH: loop header
LB: loop body
LE: loop exit
PB: predicated region body
PF: predicated region fallthrough
CT: control target
= control target key end

     0   :  { %v1942_v1 = vmov 0   ;;  %s2866_s0 = inlined_call_operand.vmem [shape: f32[4,512], index: 0, kind: input, shape index: {}]   ;;  %s2867_s1 = inlined_call_operand.vmem [shape: f32[8,512], index: 1, kind: input, shape index: {}]   ;;  %s2868_s2 = inlined_call_operand.vmem [shape: f32[144,1], index: 2, kind: input, shape index: {}]   ;;  %s2869_s3 = inlined_call_operand.vmem [shape: f32[48,12], index: 3, kind: input, shape index: {}]   ;;  %s2870_s4 = inlined_call_operand.vmem [shape: f32[108,16], index: 4, kind: input, shape index: {}]   ;;  %s2871_s5 = inlined_call_operand.hbm [shape: f32[16,512], index: 5, kind: output, shape index: {}]  }
   0x1   :  { %v44_v0 = vld [vmem:[%s2868_s2] sm:$0xf]  ;;  %1913 = vset.pattern.permute.xlu0 %v1942_v1  ;;  %1914 = vset.pattern.permute.xlu1 %v1942_v1 }
   0x2   :  { %10 = vsyncpa [#allocation4], 0  ;;  %63 = vperm.xlu0 %1913, %v44_v0   ;;  %1915 = vset.pattern.permute.xlu2 %v1942_v1  ;;  %v45_v2 = vld [vmem:[%s2868_s2 + $0x4] sm:$0xf]  ;;  %v22_v4 = vld [vmem:[%s2866_s0 + $0x8] sm:$0xff]  ;;  %vm90_vm0 = vcmask 1043456  }
   0x3   :  { %v21_v3 = vld [vmem:[%s2866_s0] sm:$0xff]  ;;  %27 = vst [vmem:[#allocation1 + $0x10] ss:$2 sm:$0xff] %v22_v4  ;;  %v47_v9 = vld [vmem:[%s2868_s2 + $0x10] sm:$0xff]  ;;  %v46_v10 = vld [vmem:[%s2868_s2 + $0x8] sm:$0xff]  ;;  %vm83_vm1 = vcmask 31744  }
   0x4   :  { %25 = vst [vmem:[#allocation1] ss:$2 sm:$0xff] %v21_v3  ;;  %202 = vperm.xlu1 %1914, %v47_v9   ;;  %v49_v11 = vld [vmem:[%s2868_s2 + $0x20] sm:$0xff]  ;;  %v48_v12 = vld [vmem:[%s2868_s2 + $0x18] sm:$0xff]  ;;  %v51_v32 = vld [vmem:[%s2869_s3 + $0x8] sm:$0xff]  ;;  %vm239_vm2 = vcmask 130048  }
   0x5   :  { %220 = vperm.xlu2 %1915, %v49_v11   ;;  %v50_v31 = vld [vmem:[%s2869_s3] sm:$0xff]  ;;  %s1943_s22 = smov 17   ;;  %s1944_s23 = smov 16   ;;  %vm688_vm11 = vcmask 64512   ;;  %vm1253_vm12 = vcmask 97280  }
   0x6   :  { %v52_v59 = vld [vmem:[%s2870_s4] sm:$0xff]  ;;  %s1945_s24 = smov 15   ;;  %s1946_s25 = smov 1  }
   0x7   :  { %v56_v9 = vld [vmem:[%s2870_s4 + $0x20] sm:$0xf]  ;;  %s1947_s26 = smov 127   ;;  %s1948_s27 = smov 113  }
   0x8   :  { %s1949_s28 = smov 112   ;;  %s1950_s29 = smov 111  }
   0xa   :  { %72 = vperm.xlu0 %1913, %v45_v2   ;;  %v30_v7 = vld.sshfl [vmem:[#allocation1 + $0x10] sm:$0xff pattern:$0x75316420]  ;;  %v31_v8 = vld.sshfl [vmem:[#allocation1 + $0x18] sm:$0xff pattern:$0x75316420] }
   0xb   :  { %v28_v5 = vld.sshfl [vmem:[#allocation1] sm:$0xff pattern:$0x75316420]  ;;  %v29_v6 = vld.sshfl [vmem:[#allocation1 + $0x8] sm:$0xff pattern:$0x75316420] }
   0xc   :  { %36 = vst [vmem:[#allocation2 + $0x30] sm:$0xf] %v28_v5  ;;  %197 = vperm.xlu1 %1914, %v46_v10  }
   0xd   :  { %37 = vst [vmem:[#allocation2] sm:$0xf] %v29_v6  ;;  %215 = vperm.xlu2 %1915, %v48_v12   ;;  %v53_v6 = vld [vmem:[%s2870_s4 + $0x8] sm:$0xff] }
   0xe   :  { %38 = vst [vmem:[#allocation2 + $0x18] sm:$0xf] %v30_v7  ;;  %v54_v7 = vld [vmem:[%s2870_s4 + $0x10] sm:$0xff] }
   0xf   :  { %39 = vst [vmem:[#allocation2 + $0x10] sm:$0xf] %v31_v8  ;;  %v55_v8 = vld [vmem:[%s2870_s4 + $0x18] sm:$0xff] }
  0x13   :  { %v57_v14 = vld [vmem:[#allocation2 + $0x30] sm:$0xf] }
  0x14   :  { %v58_v15 = vld [vmem:[#allocation2] sm:$0xf] }
  0x15   :  { %v59_v16 = vld [vmem:[#allocation2 + $0x18] sm:$0xf] }
  0x16   :  { %v60_v17 = vld [vmem:[#allocation2 + $0x10] sm:$0xf] }
  0x5f   :  { %v221_v34 = vpop.permute.xlu2 %220 }
  0x67   :  { %v216_v38 = vpop.permute.xlu2 %215 }
  0x74   :  { %v64_v13 = vpop.permute.xlu0 %63 }
  0x75   :  { %v66_v18 = vmul.f32 %v64_v13, %v57_v14  ;;  %v67_v19 = vmul.f32 %v64_v13, %v58_v15  ;;  %v68_v20 = vmul.f32 %v64_v13, %v59_v16  ;;  %v69_v21 = vmul.f32 %v64_v13, %v60_v17 }
  0x76   :  { %v203_v33 = vpop.permute.xlu1 %202 }
  0x7c   :  { %v73_v22 = vpop.permute.xlu0 %72 }
  0x7d   :  { %v75_v23 = vadd.f32 %v73_v22, %v66_v18  ;;  %v76_v24 = vadd.f32 %v73_v22, %v67_v19  ;;  %v77_v25 = vadd.f32 %v73_v22, %v68_v20  ;;  %v78_v26 = vadd.f32 %v73_v22, %v69_v21 }
  0x7e   :  { %v198_v37 = vpop.permute.xlu1 %197 }
  0x7f   :  { %v79_v27 = vmax.f32 %v75_v23, 0.0  ;;  %v80_v28 = vmax.f32 %v76_v24, 0.0  ;;  %v81_v29 = vmax.f32 %v77_v25, 0.0  ;;  %v82_v30 = vmax.f32 %v78_v26, 0.0 }
  0x81   :  { %1809 = vmatpush.msk.msra.mxu0 %vm90_vm0, %v79_v27  ;;  %1812 = vmatpush.msk.msra.mxu1 %vm90_vm0, %v80_v28 }
  0x82   :  { %1815 = vmatpush.msk.msra.mxu2 %vm90_vm0, %v81_v29  ;;  %1818 = vmatpush.msk.msra.mxu3 %vm90_vm0, %v82_v30 }
  0x83   :  { %1810 = vmatmul.msk.f32.vlgmr.msra.gmra.mxu0 %vm83_vm1, %v50_v31  ;;  %1813 = vmatmul.msk.f32.vlgmr.msra.gmra.mxu1 %vm83_vm1, %v50_v31 }
  0x84   :  { %1816 = vmatmul.msk.f32.vlgmr.msra.gmra.mxu2 %vm83_vm1, %v50_v31  ;;  %1819 = vmatmul.msk.f32.vlgmr.msra.gmra.mxu3 %vm83_vm1, %v50_v31 }
  0x8b   :  { %1811 = vmatmul.msk.f32.gmra.mxu0 %vm83_vm1, %v51_v32  ;;  %1814 = vmatmul.msk.f32.gmra.mxu1 %vm83_vm1, %v51_v32 }
  0x8c   :  { %1817 = vmatmul.msk.f32.gmra.mxu2 %vm83_vm1, %v51_v32  ;;  %1820 = vmatmul.msk.f32.gmra.mxu3 %vm83_vm1, %v51_v32 }
 0x100   :  { %v120_v35 = vpop.f32.mrf.mxu0  ;;  %v143_v36 = vpop.f32.mrf.mxu1 }
 0x101   :  { %v205_v41 = vmul.f32 %v198_v37, %v120_v35  ;;  %v206_v42 = vmul.f32 %v198_v37, %v143_v36 }
 0x103   :  { %v223_v49 = vadd.f32 %v216_v38, %v205_v41  ;;  %v224_v50 = vadd.f32 %v216_v38, %v206_v42 }
 0x105   :  { %v231_v57 = vmax.f32 %v223_v49, 0.0  ;;  %v232_v58 = vmax.f32 %v224_v50, 0.0  ;;  %v651_v49 = vld [vmem:[%s2868_s2 + $0x38] sm:$0xff]  ;;  %v654_v50 = vld [vmem:[%s2868_s2 + $0x50] sm:$0xff] }
 0x107   :  { %v166_v39 = vpop.f32.mrf.mxu2  ;;  %v189_v40 = vpop.f32.mrf.mxu3 }
 0x108   :  { %v123_v43 = vpop.f32.mrf.mxu0  ;;  %v146_v44 = vpop.f32.mrf.mxu1  ;;  %v207_v51 = vmul.f32 %v198_v37, %v166_v39  ;;  %v208_v54 = vmul.f32 %v198_v37, %v189_v40 }
 0x109   :  { %v209_v45 = vmul.f32 %v203_v33, %v123_v43  ;;  %v210_v46 = vmul.f32 %v203_v33, %v146_v44 }
 0x10a   :  { %v225_v62 = vadd.f32 %v216_v38, %v207_v51  ;;  %v226_v1 = vadd.f32 %v216_v38, %v208_v54  ;;  %v391_v54 = vlaneseq }
 0x10b   :  { %v227_v47 = vadd.f32 %v221_v34, %v209_v45  ;;  %v228_v48 = vadd.f32 %v221_v34, %v210_v46  ;;  %v649_v46 = vld [vmem:[%s2868_s2 + $0x28] sm:$0xff] }
 0x10c   :  { %v233_v4 = vmax.f32 %v225_v62, 0.0  ;;  %v234_v5 = vmax.f32 %v226_v1, 0.0 }
 0x10d   :  { %v235_v52 = vmax.f32 %v227_v47, 0.0  ;;  %v236_v53 = vmax.f32 %v228_v48, 0.0  ;;  %v650_v47 = vld [vmem:[%s2868_s2 + $0x30] sm:$0xff]  ;;  %v652_v48 = vld [vmem:[%s2868_s2 + $0x40] sm:$0xff] }
 0x10f   :  { %v169_v55 = vpop.f32.mrf.mxu2  ;;  %v192_v56 = vpop.f32.mrf.mxu3  ;;  %269 = vmatpush.msrb.mxu0 %v235_v52  ;;  %301 = vmatpush.msrb.mxu1 %v236_v53  ;;  %v653_v52 = vld [vmem:[%s2868_s2 + $0x48] sm:$0xff] }
 0x110   :  { %v211_v60 = vmul.f32 %v203_v33, %v169_v55  ;;  %v212_v61 = vmul.f32 %v203_v33, %v192_v56 }
 0x111   :  { %270 = vmatpush.msrb.mxu0 %v231_v57  ;;  %302 = vmatpush.msrb.mxu1 %v232_v58  ;;  %v2117_v57 = vand.u32 127, %v391_v54  ;;  %v2122_v58 = vld [vmem:[%s2867_s1] sm:$0xff] }
 0x112   :  { %1821 = vmatmul.msk.f32.vlgmr.msrb.gmra.mxu0 %vm239_vm2, %v52_v59  ;;  %1826 = vmatmul.msk.f32.vlgmr.msrb.gmra.mxu1 %vm239_vm2, %v52_v59  ;;  %v229_v63 = vadd.f32 %v221_v34, %v211_v60  ;;  %v230_v0 = vadd.f32 %v221_v34, %v212_v61  ;;  %v2126_v60 = vperm.slane %v2122_v58, 1  ;;  %v2130_v61 = vperm.slane %v2122_v58, 0 }
 0x113   :  { %vm426_vm3 = vcmp.lt.s32.totalorder %v2117_v57, 16  ;;  %vm393_vm4 = vcmp.lt.s32.totalorder %v2117_v57, 17  ;;  %vm451_vm5 = vcmp.lt.s32.totalorder %v2117_v57, 15  ;;  %vm488_vm6 = vcmp.lt.s32.totalorder %v2117_v57, 1 }
 0x114   :  { %v237_v2 = vmax.f32 %v229_v63, 0.0  ;;  %v238_v3 = vmax.f32 %v230_v0, 0.0  ;;  %2881 = vst [vmem:[#allocation6_spill] sm:$0xff] %v2126_v60  ;;  %v2136_v0 = vperm.slane %v2122_v58, 2  ;;  %vm529_vm7 = vcmp.lt.s32.totalorder %v2117_v57, 127 }
 0x115   :  { %2882 = vst [vmem:[#allocation7_spill] sm:$0xff] %v2130_v61  ;;  %vm554_vm8 = vcmp.lt.s32.totalorder %v2117_v57, 113  ;;  %vm616_vm9 = vcmp.lt.s32.totalorder %v2117_v57, 111  ;;  %vm591_vm10 = vcmp.lt.s32.totalorder %v2117_v57, 112 }
 0x116   :  { %333 = vmatpush.msrb.mxu2 %v237_v2  ;;  %365 = vmatpush.msrb.mxu3 %v238_v3  ;;  %2883 = vst [vmem:[#allocation8_spill] sm:$0xff] %v2136_v0 }
 0x118   :  { %334 = vmatpush.msrb.mxu2 %v233_v4  ;;  %366 = vmatpush.msrb.mxu3 %v234_v5 }
 0x119   :  { %1831 = vmatmul.msk.f32.vlgmr.msrb.gmra.mxu2 %vm239_vm2, %v52_v59  ;;  %1836 = vmatmul.msk.f32.vlgmr.msrb.gmra.mxu3 %vm239_vm2, %v52_v59 }
 0x11a   :  { %1822 = vmatmul.msk.f32.gmra.mxu0 %vm239_vm2, %v53_v6  ;;  %1827 = vmatmul.msk.f32.gmra.mxu1 %vm239_vm2, %v53_v6 }
 0x121   :  { %1832 = vmatmul.msk.f32.gmra.mxu2 %vm239_vm2, %v53_v6  ;;  %1837 = vmatmul.msk.f32.gmra.mxu3 %vm239_vm2, %v53_v6 }
 0x122   :  { %1823 = vmatmul.msk.f32.gmra.mxu0 %vm239_vm2, %v54_v7  ;;  %1828 = vmatmul.msk.f32.gmra.mxu1 %vm239_vm2, %v54_v7 }
 0x129   :  { %1833 = vmatmul.msk.f32.gmra.mxu2 %vm239_vm2, %v54_v7  ;;  %1838 = vmatmul.msk.f32.gmra.mxu3 %vm239_vm2, %v54_v7  ;;  %v2150_v7 = vld [vmem:[%s2867_s1 + $0x8] sm:$0xff] }
 0x12a   :  { %1824 = vmatmul.msk.f32.gmra.mxu0 %vm239_vm2, %v55_v8  ;;  %1829 = vmatmul.msk.f32.gmra.mxu1 %vm239_vm2, %v55_v8 }
 0x131   :  { %1834 = vmatmul.msk.f32.gmra.mxu2 %vm239_vm2, %v55_v8  ;;  %1839 = vmatmul.msk.f32.gmra.mxu3 %vm239_vm2, %v55_v8 }
 0x132   :  { %1825 = vmatmul.msk.f32.gmra.mxu0 %vm239_vm2, %v56_v9  ;;  %1830 = vmatmul.msk.f32.gmra.mxu1 %vm239_vm2, %v56_v9 }
 0x139   :  { %1835 = vmatmul.msk.f32.gmra.mxu2 %vm239_vm2, %v56_v9  ;;  %1840 = vmatmul.msk.f32.gmra.mxu3 %vm239_vm2, %v56_v9 }
 0x18f   :  { %v272_v10 = vpop.f32.mrf.mxu0  ;;  %v304_v11 = vpop.f32.mrf.mxu1 }
 0x190   :  { %v410_v12 = vrot.slane %v272_v10, 4  ;;  %385 = vrot.lane.b32.xlu0 %v304_v11, %s1943_s22  ;;  %v411_v16 = vrot.slane %v304_v11, 4  ;;  %v2154_v11 = vperm.slane %v2150_v7, 0 }
 0x192   :  { %418 = vrot.lane.b32.xlu1 %v410_v12, %s1944_s23  ;;  %2884 = vst [vmem:[#allocation9_spill] sm:$0xff] %v2154_v11 }
 0x197   :  { %v275_v13 = vpop.f32.mrf.mxu0  ;;  %v307_v19 = vpop.f32.mrf.mxu1 }
 0x198   :  { %383 = vrot.lane.b32.xlu0 %v272_v10, %s1943_s22  ;;  %443 = vrot.lane.b32.xlu2 %v275_v13, %s1945_s24  ;;  %v473_v22 = vrot.slane %v307_v19, 4  ;;  %v472_v41 = vrot.slane %v275_v13, 4  ;;  %v2159_v13 = vperm.slane %v2150_v7, 1 }
 0x19a   :  { %2885 = vst [vmem:[#allocation10_spill] sm:$0xff] %v2159_v13 }
 0x19c   :  { %v336_v14 = vpop.f32.mrf.mxu2  ;;  %v368_v15 = vpop.f32.mrf.mxu3 }
 0x19d   :  { %387 = vrot.lane.b32.xlu1 %v336_v14, %s1943_s22  ;;  %v412_v17 = vrot.slane %v336_v14, 4  ;;  %v413_v18 = vrot.slane %v368_v15, 4 }
 0x19f   :  { %v2064_v23 = vpop.f32.mrf.mxu0  ;;  %v2085_v38 = vpop.f32.mrf.mxu1 }
 0x1a0   :  { %420 = vrot.lane.b32.xlu0 %v411_v16, %s1944_s23  ;;  %389 = vrot.lane.b32.xlu2 %v368_v15, %s1943_s22  ;;  %v513_v26 = vrot.slane %v2064_v23, 4  ;;  %v514_v43 = vrot.slane %v2085_v38, 4 }
 0x1a4   :  { %v339_v20 = vpop.f32.mrf.mxu2  ;;  %v371_v21 = vpop.f32.mrf.mxu3 }
 0x1a5   :  { %422 = vrot.lane.b32.xlu1 %v412_v17, %s1944_s23  ;;  %v474_v24 = vrot.slane %v339_v20, 4  ;;  %v475_v25 = vrot.slane %v371_v21, 4 }
 0x1a7   :  { %v281_v29 = vpop.f32.mrf.mxu0  ;;  %v313_v42 = vpop.f32.mrf.mxu1 }
 0x1a8   :  { %445 = vrot.lane.b32.xlu0 %v307_v19, %s1945_s24  ;;  %424 = vrot.lane.b32.xlu2 %v413_v18, %s1944_s23  ;;  %v575_v30 = vrot.slane %v281_v29, 4  ;;  %v576_v44 = vrot.slane %v313_v42, 4 }
 0x1ac   :  { %v2070_v27 = vpop.f32.mrf.mxu2  ;;  %v2075_v31 = vpop.f32.mrf.mxu3 }
 0x1ad   :  { %447 = vrot.lane.b32.xlu1 %v339_v20, %s1945_s24  ;;  %v515_v28 = vrot.slane %v2070_v27, 4  ;;  %v516_v34 = vrot.slane %v2075_v31, 4 }
 0x1af   :  { %v284_v33 = vpop.f32.mrf.mxu0  ;;  %v316_v45 = vpop.f32.mrf.mxu1 }
 0x1b0   :  { %482 = vrot.lane.b32.xlu0 %v473_v22, %s1946_s25  ;;  %449 = vrot.lane.b32.xlu2 %v371_v21, %s1945_s24  ;;  %v2168_v21 = vperm.slane %v2150_v7, 2 }
 0x1b2   :  { %2886 = vst [vmem:[#allocation11_spill] sm:$0xff] %v2168_v21 }
 0x1b4   :  { %v345_v32 = vpop.f32.mrf.mxu2  ;;  %v377_v35 = vpop.f32.mrf.mxu3 }
 0x1b5   :  { %484 = vrot.lane.b32.xlu1 %v474_v24, %s1946_s25  ;;  %v578_v36 = vrot.slane %v377_v35, 4  ;;  %v577_v37 = vrot.slane %v345_v32, 4 }
 0x1b8   :  { %486 = vrot.lane.b32.xlu2 %v475_v25, %s1946_s25  ;;  %521 = vrot.lane.b32.xlu0 %v513_v26, %s1947_s26 }
 0x1bc   :  { %v348_v39 = vpop.f32.mrf.mxu2  ;;  %v380_v40 = vpop.f32.mrf.mxu3 }
 0x1bd   :  { %525 = vrot.lane.b32.xlu1 %v515_v28, %s1947_s26 }
 0x1c0   :  { %546 = vrot.lane.b32.xlu0 %v281_v29, %s1948_s27  ;;  %583 = vrot.lane.b32.xlu2 %v575_v30, %s1949_s28 }
 0x1c5   :  { %550 = vrot.lane.b32.xlu1 %v345_v32, %s1948_s27 }
 0x1c8   :  { %527 = vrot.lane.b32.xlu2 %v516_v34, %s1947_s26  ;;  %608 = vrot.lane.b32.xlu0 %v284_v33, %s1950_s29  ;;  %v43_v33 = vld [vmem:[%s2867_s1 + $0x18] sm:$0xff] }
 0x1cd   :  { %589 = vrot.lane.b32.xlu1 %v578_v36, %s1949_s28 }
 0x1d0   :  { %552 = vrot.lane.b32.xlu2 %v377_v35, %s1948_s27  ;;  %587 = vrot.lane.b32.xlu0 %v577_v37, %s1949_s28  ;;  %v2184_v35 = vperm.slane %v43_v33, 1 }
 0x1d2   :  { %2887 = vst [vmem:[#allocation12_spill] sm:$0xff] %v2184_v35 }
 0x1d5   :  { %612 = vrot.lane.b32.xlu1 %v348_v39, %s1950_s29  ;;  %v2188_v39 = vperm.slane %v43_v33, 0 }
 0x1d8   :  { %614 = vrot.lane.b32.xlu2 %v380_v40, %s1950_s29  ;;  %480 = vrot.lane.b32.xlu0 %v472_v41, %s1946_s25  ;;  %v2190_v40 = vperm.slane %v43_v33, 2 }
 0x1dd   :  { %523 = vrot.lane.b32.xlu1 %v514_v43, %s1947_s26 }
 0x1e0   :  { %548 = vrot.lane.b32.xlu2 %v313_v42, %s1948_s27  ;;  %585 = vrot.lane.b32.xlu0 %v576_v44, %s1949_s28  ;;  %v2198_v44 = vperm.slane %v43_v33, 3 }
 0x1e5   :  { %610 = vrot.lane.b32.xlu1 %v316_v45, %s1950_s29 }
 0x1e8   :  { %668 = vperm.xlu2 %1915, %v649_v46   ;;  %677 = vperm.xlu0 %1913, %v650_v47   ;;  %v42_v47 = vld [vmem:[%s2867_s1 + $0x10] sm:$0xff] }
 0x1ed   :  { %794 = vperm.xlu1 %1914, %v652_v48  }
 0x1f0   :  { %789 = vperm.xlu2 %1915, %v651_v49   ;;  %812 = vperm.xlu0 %1913, %v654_v50   ;;  %v2210_v50 = vperm.slane %v42_v47, 1 }
 0x1f2   :  { %v444_v51 = vpop.permute.xlu2 %443  ;;  %2888 = vst [vmem:[#allocation13_spill] sm:$0xff] %v2210_v50 }
 0x1f5   :  { %807 = vperm.xlu1 %1914, %v653_v52  }
 0x1fa   :  { %v390_v53 = vpop.permute.xlu2 %389 }
 0x202   :  { %v2115_v55 = vpop.permute.xlu0 %385  ;;  %v425_v56 = vpop.permute.xlu2 %424 }
 0x204   :  { %v419_v59 = vpop.permute.xlu1 %418 }
 0x205   :  { %v430_v62 = vsel %vm426_vm3, %v425_v56, %v419_v59 }
 0x206   :  { %v435_v5 = vmul.f32 %v2126_v60, %v430_v62 }
 0x20a   :  { %v384_v63 = vpop.permute.xlu0 %383  ;;  %v450_v1 = vpop.permute.xlu2 %449 }
 0x20b   :  { %v396_v2 = vsel %vm393_vm4, %v384_v63, %v2115_v55  ;;  %v397_v3 = vsel %vm393_vm4, %v390_v53, %v384_v63  ;;  %v455_v4 = vsel %vm451_vm5, %v450_v1, %v444_v51 }
 0x20c   :  { %v402_v6 = vmul.f32 %v2130_v61, %v397_v3  ;;  %v460_v9 = vmul.f32 %v2136_v0, %v455_v4  ;;  %v403_v16 = vmul.f32 %v2154_v11, %v396_v2  ;;  %v2228_v4 = vperm.slane %v42_v47, 3 }
 0x20e   :  { %v439_v8 = vadd.f32 %v435_v5, %v402_v6 }
 0x20f   :  { %v388_v10 = vpop.permute.xlu1 %387 }
 0x210   :  { %v2156_v12 = vadd.f32 %v460_v9, %v439_v8  ;;  %v394_v41 = vsel %vm393_vm4, %v388_v10, %v390_v53  ;;  %v395_v62 = vsel %vm393_vm4, %v2115_v55, %v388_v10  ;;  %v2233_v8 = vperm.slane %v43_v33, 4 }
 0x211   :  { %v405_v48 = vmul.f32 %v2188_v39, %v394_v41 }
 0x212   :  { %v421_v14 = vpop.permute.xlu0 %420  ;;  %v2165_v19 = vpop.permute.xlu2 %486 }
 0x213   :  { %v429_v15 = vsel %vm426_vm3, %v419_v59, %v421_v14  ;;  %v2219_v59 = vperm.slane %v42_v47, 2 }
 0x214   :  { %v436_v17 = vmul.f32 %v2159_v13, %v429_v15  ;;  %v2243_v15 = vperm.slane %v43_v33, 5 }
 0x216   :  { %v440_v18 = vadd.f32 %v436_v17, %v403_v16 }
 0x217   :  { %v423_v20 = vpop.permute.xlu1 %422 }
 0x218   :  { %v427_v37 = vsel %vm426_vm3, %v423_v20, %v425_v56  ;;  %v428_v52 = vsel %vm426_vm3, %v421_v14, %v423_v20  ;;  %v2217_v56 = vperm.slane %v42_v47, 0 }
 0x219   :  { %v438_v43 = vmul.f32 %v2184_v35, %v427_v37  ;;  %v437_v3 = vmul.f32 %v2210_v50, %v428_v52  ;;  %v2258_v37 = vperm.slane %v43_v33, 6 }
 0x21a   :  { %v446_v22 = vpop.permute.xlu0 %445  ;;  %v2175_v29 = vpop.permute.xlu2 %583  ;;  %v404_v9 = vmul.f32 %v2217_v56, %v395_v62 }
 0x21b   :  { %v454_v24 = vsel %vm451_vm5, %v444_v51, %v446_v22  ;;  %v442_v53 = vadd.f32 %v438_v43, %v405_v48  ;;  %v2265_v48 = vperm.slane %v43_v33, 7  ;;  %v2278_v33 = vperm.slane %v42_v47, 6 }
 0x21c   :  { %v461_v25 = vmul.f32 %v2168_v21, %v454_v24  ;;  %v441_v16 = vadd.f32 %v437_v3, %v404_v9 }
 0x21e   :  { %v2173_v26 = vadd.f32 %v461_v25, %v440_v18 }
 0x21f   :  { %v448_v28 = vpop.permute.xlu1 %447 }
 0x220   :  { %v452_v42 = vsel %vm451_vm5, %v448_v28, %v450_v1  ;;  %v453_v63 = vsel %vm451_vm5, %v446_v22, %v448_v28  ;;  %v2253_v28 = vperm.slane %v42_v47, 4 }
 0x221   :  { %v463_v49 = vmul.f32 %v2190_v40, %v452_v42  ;;  %v462_v10 = vmul.f32 %v2219_v59, %v453_v63 }
 0x222   :  { %v2177_v30 = vpop.permute.xlu0 %482  ;;  %v528_v36 = vpop.permute.xlu2 %527 }
 0x223   :  { %v467_v1 = vadd.f32 %v463_v49, %v442_v53  ;;  %v466_v25 = vadd.f32 %v462_v10, %v441_v16 }
 0x227   :  { %v485_v32 = vpop.permute.xlu1 %484 }
 0x228   :  { %v489_v46 = vsel %vm488_vm6, %v485_v32, %v2165_v19  ;;  %v490_v5 = vsel %vm488_vm6, %v2177_v30, %v485_v32 }
 0x229   :  { %v500_v54 = vmul.f32 %v2198_v44, %v489_v46  ;;  %v499_v17 = vmul.f32 %v2228_v4, %v490_v5  ;;  %v2263_v46 = vperm.slane %v42_v47, 5 }
 0x22a   :  { %v2182_v34 = vpop.permute.xlu0 %521  ;;  %v553_v2 = vpop.permute.xlu2 %552 }
 0x22b   :  { %v504_v6 = vadd.f32 %v500_v54, %v467_v1  ;;  %v533_v14 = vsel %vm529_vm7, %v528_v36, %v2182_v34  ;;  %v503_v41 = vadd.f32 %v499_v17, %v466_v25  ;;  %v2286_v17 = vperm.slane %v42_v47, 7 }
 0x22c   :  { %v541_v24 = vmul.f32 %v2233_v8, %v533_v14  ;;  %v2291_v25 = vperm.slane %v2122_v58, 3 }
 0x22d   :  { %v508_v22 = vadd.f32 %v504_v6, %v2075_v31  ;;  %v507_v1 = vadd.f32 %v503_v41, %v2070_v27 }
 0x22f   :  { %v2200_v45 = vpop.permute.xlu1 %525  ;;  %v545_v43 = vadd.f32 %v541_v24, %v508_v22 }
 0x230   :  { %v530_v42 = vsel %vm529_vm7, %v2200_v45, %v528_v36 }
 0x231   :  { %v540_v36 = vmul.f32 %v2253_v28, %v530_v42 }
 0x232   :  { %v2212_v51 = vpop.permute.xlu0 %546  ;;  %v615_v31 = vpop.permute.xlu2 %614 }
 0x233   :  { %v558_v18 = vsel %vm554_vm8, %v553_v2, %v2212_v51  ;;  %v544_v10 = vadd.f32 %v540_v36, %v507_v1  ;;  %v2312_v1 = vperm.slane %v2122_v58, 5 }
 0x234   :  { %v566_v32 = vmul.f32 %v2243_v15, %v558_v18 }
 0x236   :  { %v570_v62 = vadd.f32 %v566_v32, %v545_v43  ;;  %v2294_v32 = vperm.slane %v2150_v7, 3 }
 0x237   :  { %v2236_v55 = vpop.permute.xlu1 %550 }
 0x238   :  { %v555_v52 = vsel %vm554_vm8, %v2236_v55, %v553_v2 }
 0x239   :  { %v565_v2 = vmul.f32 %v2263_v46, %v555_v52 }
 0x23a   :  { %v2249_v20 = vpop.permute.xlu0 %608  ;;  %v549_v52 = vpop.permute.xlu2 %548 }
 0x23b   :  { %v620_v53 = vsel %vm616_vm9, %v615_v31, %v2249_v20  ;;  %v569_v18 = vadd.f32 %v565_v2, %v544_v10  ;;  %v2326_v10 = vperm.slane %v2122_v58, 6 }
 0x23c   :  { %v628_v5 = vmul.f32 %v2265_v48, %v620_v53 }
 0x23f   :  { %v590_v49 = vpop.permute.xlu1 %589 }
 0x240   :  { %v595_v54 = vsel %vm591_vm10, %v590_v49, %v2175_v29 }
 0x241   :  { %v603_v63 = vmul.f32 %v2258_v37, %v595_v54 }
 0x242   :  { %v588_v3 = vpop.permute.xlu0 %587 }
 0x243   :  { %v607_v6 = vadd.f32 %v603_v63, %v570_v62  ;;  %v592_v9 = vsel %vm591_vm10, %v588_v3, %v590_v49  ;;  %v2306_v62 = vperm.slane %v2122_v58, 4  ;;  %v2309_v63 = vperm.slane %v2150_v7, 4 }
 0x244   :  { %v602_v16 = vmul.f32 %v2278_v33, %v592_v9 }
 0x245   :  { %v632_v14 = vadd.f32 %v628_v5, %v607_v6  ;;  %v556_v5 = vsel %vm554_vm8, %v549_v52, %v2236_v55  ;;  %v557_v6 = vsel %vm554_vm8, %v2212_v51, %v549_v52 }
 0x246   :  { %v606_v41 = vadd.f32 %v602_v16, %v569_v18 }
 0x247   :  { %v640_v22 = vrot.slane %v632_v14, 4  ;;  %v613_v24 = vpop.permute.xlu1 %612 }
 0x248   :  { %v617_v27 = vsel %vm616_vm9, %v613_v24, %v615_v31 }
 0x249   :  { %648 = vst [vmem:[#allocation2 + $0x10] sm:$0xf0] %v640_v22  ;;  %v627_v42 = vmul.f32 %v2286_v17, %v617_v27  ;;  %v2342_v22 = vperm.slane %v2150_v7, 6 }
 0x24a   :  { %v481_v43 = vpop.permute.xlu0 %480 }
 0x24b   :  { %v631_v49 = vadd.f32 %v627_v42, %v606_v41  ;;  %v491_v47 = vsel %vm488_vm6, %v481_v43, %v2177_v30  ;;  %v492_v31 = vsel %vm488_vm6, %v2165_v19, %v481_v43  ;;  %v2315_v30 = vperm.slane %v2150_v7, 5 }
 0x24c   :  { %v497_v53 = vmul.f32 %v2291_v25, %v492_v31  ;;  %v498_v54 = vmul.f32 %v2294_v32, %v491_v47 }
 0x24d   :  { %v639_v36 = vrot.slane %v631_v49, 4  ;;  %v2353_v49 = vperm.slane %v2122_v58, 7 }
 0x24e   :  { %v501_v19 = vadd.f32 %v497_v53, %v2156_v12  ;;  %v502_v2 = vadd.f32 %v498_v54, %v2173_v26  ;;  %v2357_v53 = vperm.slane %v2150_v7, 7 }
 0x24f   :  { %647 = vst [vmem:[#allocation2 + $0x18] sm:$0xf0] %v639_v36  ;;  %v524_v9 = vpop.permute.xlu1 %523  ;;  %v669_v36 = vpop.permute.xlu2 %668 }
 0x250   :  { %v2328_v14 = vld [vmem:[#allocation2 + $0x10] sm:$0xff]  ;;  %v505_v16 = vadd.f32 %v501_v19, %v2064_v23  ;;  %v506_v12 = vadd.f32 %v502_v2, %v2085_v38  ;;  %v531_v26 = vsel %vm529_vm7, %v524_v9, %v2200_v45  ;;  %v532_v55 = vsel %vm529_vm7, %v2182_v34, %v524_v9 }
 0x251   :  { %1786 = vst [vmem:[#allocation3 + $0x18] sm:$0xff] %v2328_v14  ;;  %v538_v51 = vmul.f32 %v2306_v62, %v532_v55  ;;  %v539_v18 = vmul.f32 %v2309_v63, %v531_v26  ;;  %v563_v23 = vmul.f32 %v2312_v1, %v557_v6  ;;  %v564_v38 = vmul.f32 %v2315_v30, %v556_v5 }
 0x252   :  { %v586_v27 = vpop.permute.xlu0 %585 }
 0x253   :  { %v542_v41 = vadd.f32 %v538_v51, %v505_v16  ;;  %v543_v45 = vadd.f32 %v539_v18, %v506_v12  ;;  %v593_v42 = vsel %vm591_vm10, %v586_v27, %v588_v3  ;;  %v594_v34 = vsel %vm591_vm10, %v2175_v29, %v586_v27  ;;  %v656_v27 = vld [vmem:[%s2869_s3 + $0x18] sm:$0xff] }
 0x254   :  { %v600_v43 = vmul.f32 %v2326_v10, %v594_v34  ;;  %v601_v52 = vmul.f32 %v2342_v22, %v593_v42  ;;  %v674_v29 = vmul.f32 %v2328_v14, %v669_v36 }
 0x255   :  { %v567_v47 = vadd.f32 %v563_v23, %v542_v41  ;;  %v568_v31 = vadd.f32 %v564_v38, %v543_v45 }
 0x256   :  { %v2359_v54 = vld [vmem:[#allocation2 + $0x18] sm:$0xff] }
 0x257   :  { %1785 = vst [vmem:[#allocation3 + $0x10] sm:$0xff] %v2359_v54  ;;  %v611_v3 = vpop.permute.xlu1 %610  ;;  %v604_v19 = vadd.f32 %v600_v43, %v567_v47  ;;  %v605_v5 = vadd.f32 %v601_v52, %v568_v31  ;;  %v673_v9 = vmul.f32 %v2359_v54, %v669_v36 }
 0x258   :  { %v618_v58 = vsel %vm616_vm9, %v611_v3, %v613_v24  ;;  %v619_v2 = vsel %vm616_vm9, %v2249_v20, %v611_v3  ;;  %v655_v20 = vld [vmem:[%s2869_s3 + $0x10] sm:$0xff] }
 0x259   :  { %v625_v7 = vmul.f32 %v2353_v49, %v619_v2  ;;  %v626_v6 = vmul.f32 %v2357_v53, %v618_v58 }
 0x25a   :  { %v678_v16 = vpop.permute.xlu0 %677 }
 0x25b   :  { %v629_v12 = vadd.f32 %v625_v7, %v604_v19  ;;  %v630_v26 = vadd.f32 %v626_v6, %v605_v5  ;;  %v682_v55 = vadd.f32 %v678_v16, %v673_v9  ;;  %v683_v51 = vadd.f32 %v678_v16, %v674_v29  ;;  %v790_v19 = vpop.permute.xlu2 %789 }
 0x25d   :  { %v637_v18 = vrot.slane %v629_v12, 4  ;;  %v638_v23 = vrot.slane %v630_v26, 4  ;;  %v686_v24 = vmax.f32 %v682_v55, 0.0  ;;  %v687_v38 = vmax.f32 %v683_v51, 0.0 }
 0x25f   :  { %645 = vst [vmem:[#allocation2 + $0x30] sm:$0xf0] %v637_v18  ;;  %756 = vmatpush.msra.mxu2 %v686_v24  ;;  %779 = vmatpush.msra.mxu3 %v687_v38  ;;  %v795_v3 = vpop.permute.xlu1 %794 }
 0x260   :  { %646 = vst [vmem:[#allocation2] sm:$0xf0] %v638_v23  ;;  %1845 = vmatmul.msk.f32.vlgmr.msra.gmra.mxu2 %vm688_vm11, %v655_v20  ;;  %1847 = vmatmul.msk.f32.vlgmr.msra.gmra.mxu3 %vm688_vm11, %v655_v20 }
 0x262   :  { %v813_v12 = vpop.permute.xlu0 %812 }
 0x266   :  { %v2379_v41 = vld [vmem:[#allocation2 + $0x30] sm:$0xff] }
 0x267   :  { %v2381_v45 = vld [vmem:[#allocation2] sm:$0xff]  ;;  %1783 = vst [vmem:[#allocation3] sm:$0xff] %v2379_v41  ;;  %v671_v42 = vmul.f32 %v2379_v41, %v669_v36  ;;  %v808_v26 = vpop.permute.xlu1 %807 }
 0x268   :  { %2889 = vst [vmem:[#allocation14_spill] sm:$0xff] %v2381_v45  ;;  %v672_v34 = vmul.f32 %v2381_v45, %v669_v36  ;;  %1846 = vmatmul.msk.f32.gmra.mxu2 %vm688_vm11, %v656_v27  ;;  %1848 = vmatmul.msk.f32.gmra.mxu3 %vm688_vm11, %v656_v27 }
 0x269   :  { %1784 = vst [vmem:[#allocation3 + $0x8] sm:$0xff] %v2381_v45  ;;  %v680_v43 = vadd.f32 %v678_v16, %v671_v42 }
 0x26a   :  { %v681_v47 = vadd.f32 %v678_v16, %v672_v34 }
 0x26b   :  { %v684_v31 = vmax.f32 %v680_v43, 0.0 }
 0x26c   :  { %v685_v52 = vmax.f32 %v681_v47, 0.0 }
 0x26d   :  { %710 = vmatpush.msra.mxu0 %v684_v31 }
 0x26e   :  { %733 = vmatpush.msra.mxu1 %v685_v52  ;;  %1841 = vmatmul.msk.f32.vlgmr.msra.gmra.mxu0 %vm688_vm11, %v655_v20 }
 0x26f   :  { %1843 = vmatmul.msk.f32.vlgmr.msra.gmra.mxu1 %vm688_vm11, %v655_v20 }
 0x276   :  { %1842 = vmatmul.msk.f32.gmra.mxu0 %vm688_vm11, %v656_v27 }
 0x277   :  { %1844 = vmatmul.msk.f32.gmra.mxu1 %vm688_vm11, %v656_v27 }
 0x2e3   :  { %v758_v36 = vpop.f32.mrf.mxu2  ;;  %v781_v29 = vpop.f32.mrf.mxu3 }
 0x2e4   :  { %v799_v58 = vmul.f32 %v790_v19, %v758_v36  ;;  %v800_v2 = vmul.f32 %v790_v19, %v781_v29  ;;  %v657_v36 = vld [vmem:[%s2870_s4 + $0x24] sm:$0xff] }
 0x2e6   :  { %v817_v51 = vadd.f32 %v808_v26, %v799_v58  ;;  %v818_v23 = vadd.f32 %v808_v26, %v800_v2 }
 0x2e8   :  { %v825_v27 = vmax.f32 %v817_v51, 0.0  ;;  %v826_v34 = vmax.f32 %v818_v23, 0.0 }
 0x2eb   :  { %v712_v5 = vpop.f32.mrf.mxu0  ;;  %v761_v7 = vpop.f32.mrf.mxu2 }
 0x2ec   :  { %v735_v6 = vpop.f32.mrf.mxu1  ;;  %v803_v9 = vmul.f32 %v795_v3, %v761_v7  ;;  %v784_v16 = vpop.f32.mrf.mxu3  ;;  %v797_v42 = vmul.f32 %v790_v19, %v712_v5 }
 0x2ed   :  { %v804_v55 = vmul.f32 %v795_v3, %v784_v16  ;;  %v798_v43 = vmul.f32 %v790_v19, %v735_v6 }
 0x2ee   :  { %v821_v18 = vadd.f32 %v813_v12, %v803_v9  ;;  %v815_v58 = vadd.f32 %v808_v26, %v797_v42 }
 0x2ef   :  { %v822_v24 = vadd.f32 %v813_v12, %v804_v55  ;;  %v816_v5 = vadd.f32 %v808_v26, %v798_v43  ;;  %v660_v26 = vld [vmem:[%s2870_s4 + $0x3c] sm:$0xff]  ;;  %v661_v55 = vld [vmem:[%s2870_s4 + $0x44] sm:$0xf] }
 0x2f0   :  { %v829_v38 = vmax.f32 %v821_v18, 0.0  ;;  %v823_v9 = vmax.f32 %v815_v58, 0.0 }
 0x2f1   :  { %v830_v20 = vmax.f32 %v822_v24, 0.0  ;;  %v824_v16 = vmax.f32 %v816_v5, 0.0 }
 0x2f2   :  { %924 = vmatpush.msrb.mxu2 %v829_v38 }
 0x2f3   :  { %v715_v47 = vpop.f32.mrf.mxu0  ;;  %956 = vmatpush.msrb.mxu3 %v830_v20 }
 0x2f4   :  { %v801_v31 = vmul.f32 %v795_v3, %v715_v47  ;;  %v738_v52 = vpop.f32.mrf.mxu1  ;;  %925 = vmatpush.msrb.mxu2 %v825_v27 }
 0x2f5   :  { %v802_v29 = vmul.f32 %v795_v3, %v738_v52  ;;  %957 = vmatpush.msrb.mxu3 %v826_v34  ;;  %1859 = vmatmul.msk.f32.vlgmr.msrb.gmra.mxu2 %vm239_vm2, %v657_v36  ;;  %v658_v3 = vld [vmem:[%s2870_s4 + $0x2c] sm:$0xff] }
 0x2f6   :  { %v819_v2 = vadd.f32 %v813_v12, %v801_v31  ;;  %1864 = vmatmul.msk.f32.vlgmr.msrb.gmra.mxu3 %vm239_vm2, %v657_v36 }
 0x2f7   :  { %v820_v7 = vadd.f32 %v813_v12, %v802_v29  ;;  %v659_v12 = vld [vmem:[%s2870_s4 + $0x34] sm:$0xff] }
 0x2f8   :  { %v827_v19 = vmax.f32 %v819_v2, 0.0 }
 0x2f9   :  { %v828_v6 = vmax.f32 %v820_v7, 0.0 }
 0x2fa   :  { %860 = vmatpush.msrb.mxu0 %v827_v19 }
 0x2fb   :  { %892 = vmatpush.msrb.mxu1 %v828_v6 }
 0x2fc   :  { %861 = vmatpush.msrb.mxu0 %v823_v9 }
 0x2fd   :  { %893 = vmatpush.msrb.mxu1 %v824_v16  ;;  %1849 = vmatmul.msk.f32.vlgmr.msrb.gmra.mxu0 %vm239_vm2, %v657_v36 }
 0x2fe   :  { %1854 = vmatmul.msk.f32.vlgmr.msrb.gmra.mxu1 %vm239_vm2, %v657_v36  ;;  %1860 = vmatmul.msk.f32.gmra.mxu2 %vm239_vm2, %v658_v3 }
 0x2ff   :  { %1865 = vmatmul.msk.f32.gmra.mxu3 %vm239_vm2, %v658_v3 }
 0x305   :  { %1850 = vmatmul.msk.f32.gmra.mxu0 %vm239_vm2, %v658_v3 }
 0x306   :  { %1855 = vmatmul.msk.f32.gmra.mxu1 %vm239_vm2, %v658_v3  ;;  %1861 = vmatmul.msk.f32.gmra.mxu2 %vm239_vm2, %v659_v12 }
 0x307   :  { %1866 = vmatmul.msk.f32.gmra.mxu3 %vm239_vm2, %v659_v12 }
 0x30d   :  { %1851 = vmatmul.msk.f32.gmra.mxu0 %vm239_vm2, %v659_v12 }
 0x30e   :  { %1862 = vmatmul.msk.f32.gmra.mxu2 %vm239_vm2, %v660_v26  ;;  %1856 = vmatmul.msk.f32.gmra.mxu1 %vm239_vm2, %v659_v12 }
 0x30f   :  { %1867 = vmatmul.msk.f32.gmra.mxu3 %vm239_vm2, %v660_v26 }
 0x315   :  { %1852 = vmatmul.msk.f32.gmra.mxu0 %vm239_vm2, %v660_v26 }
 0x316   :  { %1863 = vmatmul.msk.f32.gmra.mxu2 %vm239_vm2, %v661_v55  ;;  %1857 = vmatmul.msk.f32.gmra.mxu1 %vm239_vm2, %v660_v26 }
 0x317   :  { %1868 = vmatmul.msk.f32.gmra.mxu3 %vm239_vm2, %v661_v55 }
 0x31d   :  { %1853 = vmatmul.msk.f32.gmra.mxu0 %vm239_vm2, %v661_v55 }
 0x31e   :  { %1858 = vmatmul.msk.f32.gmra.mxu1 %vm239_vm2, %v661_v55 }
 0x378   :  { %v927_v38 = vpop.f32.mrf.mxu2 }
 0x379   :  { %v959_v27 = vpop.f32.mrf.mxu3  ;;  %v996_v34 = vrot.slane %v927_v38, 4 }
 0x37a   :  { %v863_v51 = vpop.f32.mrf.mxu0  ;;  %v997_v47 = vrot.slane %v959_v27, 4 }
 0x37b   :  { %v994_v18 = vrot.slane %v863_v51, 4  ;;  %974 = vrot.lane.b32.xlu2 %v863_v51, %s1943_s22  ;;  %v895_v23 = vpop.f32.mrf.mxu1 }
 0x37c   :  { %v995_v20 = vrot.slane %v895_v23, 4 }
 0x37d   :  { %1002 = vrot.lane.b32.xlu0 %v994_v18, %s1944_s23 }
 0x381   :  { %v930_v31 = vpop.f32.mrf.mxu2 }
 0x382   :  { %v866_v24 = vpop.f32.mrf.mxu0  ;;  %v1048_v58 = vrot.slane %v930_v31, 4  ;;  %v962_v7 = vpop.f32.mrf.mxu3 }
 0x383   :  { %976 = vrot.lane.b32.xlu2 %v895_v23, %s1943_s22  ;;  %1022 = vrot.lane.b32.xlu1 %v866_v24, %s1945_s24  ;;  %v898_v29 = vpop.f32.mrf.mxu1  ;;  %v1049_v6 = vrot.slane %v962_v7, 4 }
 0x384   :  { %v1047_v5 = vrot.slane %v898_v29, 4 }
 0x385   :  { %978 = vrot.lane.b32.xlu0 %v927_v38, %s1943_s22 }
 0x389   :  { %v2445_v2 = vpop.f32.mrf.mxu2 }
 0x38a   :  { %v2433_v42 = vpop.f32.mrf.mxu0  ;;  %v1084_v19 = vrot.slane %v2445_v2, 4  ;;  %v2453_v16 = vpop.f32.mrf.mxu3 }
 0x38b   :  { %1004 = vrot.lane.b32.xlu2 %v995_v20, %s1944_s23  ;;  %980 = vrot.lane.b32.xlu1 %v959_v27, %s1943_s22  ;;  %v1082_v43 = vrot.slane %v2433_v42, 4  ;;  %v2456_v3 = vpop.f32.mrf.mxu1  ;;  %v1085_v12 = vrot.slane %v2453_v16, 4  ;;  %v1046_v27 = vrot.slane %v866_v24, 4  ;;  %v1186_v24 = vld [vmem:[%s2868_s2 + $0x58] sm:$0xff] }
 0x38c   :  { %v1083_v55 = vrot.slane %v2456_v3, 4 }
 0x38d   :  { %1006 = vrot.lane.b32.xlu0 %v996_v34, %s1944_s23 }
 0x391   :  { %v936_v9 = vpop.f32.mrf.mxu2 }
 0x392   :  { %v872_v52 = vpop.f32.mrf.mxu0  ;;  %v968_v51 = vpop.f32.mrf.mxu3  ;;  %v1136_v18 = vrot.slane %v936_v9, 4 }
 0x393   :  { %1008 = vrot.lane.b32.xlu1 %v997_v47, %s1944_s23  ;;  %1090 = vrot.lane.b32.xlu2 %v1082_v43, %s1947_s26  ;;  %v1134_v36 = vrot.slane %v872_v52, 4  ;;  %v1137_v23 = vrot.slane %v968_v51, 4  ;;  %v904_v20 = vpop.f32.mrf.mxu1 }
 0x394   :  { %v1135_v43 = vrot.slane %v904_v20, 4 }
 0x395   :  { %1026 = vrot.lane.b32.xlu0 %v930_v31, %s1945_s24  ;;  %v1187_v31 = vld [vmem:[%s2868_s2 + $0x60] sm:$0xf] }
 0x399   :  { %v939_v34 = vpop.f32.mrf.mxu2 }
 0x39a   :  { %v875_v26 = vpop.f32.mrf.mxu0  ;;  %v971_v38 = vpop.f32.mrf.mxu3 }
 0x39b   :  { %1024 = vrot.lane.b32.xlu2 %v898_v29, %s1945_s24  ;;  %1142 = vrot.lane.b32.xlu1 %v1134_v36, %s1949_s28  ;;  %v907_v47 = vpop.f32.mrf.mxu1  ;;  %v1188_v29 = vld [vmem:[%s2868_s2 + $0x64] sm:$0xff] }
 0x39d   :  { %1058 = vrot.lane.b32.xlu0 %v1048_v58, %s1946_s25  ;;  %v1191_v58 = vld [vmem:[%s2868_s2 + $0x78] sm:$0xff] }
 0x3a3   :  { %1056 = vrot.lane.b32.xlu2 %v1047_v5, %s1946_s25  ;;  %1028 = vrot.lane.b32.xlu1 %v962_v7, %s1945_s24  ;;  %v1190_v5 = vld [vmem:[%s2868_s2 + $0x70] sm:$0xff] }
 0x3a5   :  { %1094 = vrot.lane.b32.xlu0 %v1084_v19, %s1947_s26  ;;  %v1193_v19 = vld [vmem:[%s2868_s2 + $0x88] sm:$0xff] }
 0x3ab   :  { %1110 = vrot.lane.b32.xlu2 %v872_v52, %s1948_s27  ;;  %1060 = vrot.lane.b32.xlu1 %v1049_v6, %s1946_s25  ;;  %v1189_v52 = vld [vmem:[%s2868_s2 + $0x6c] sm:$0xf]  ;;  %v1192_v6 = vld [vmem:[%s2868_s2 + $0x80] sm:$0xff] }
 0x3ad   :  { %1114 = vrot.lane.b32.xlu0 %v936_v9, %s1948_s27 }
 0x3b3   :  { %1096 = vrot.lane.b32.xlu1 %v1085_v12, %s1947_s26  ;;  %1162 = vrot.lane.b32.xlu2 %v875_v26, %s1950_s29 }
 0x3b5   :  { %1092 = vrot.lane.b32.xlu0 %v1083_v55, %s1947_s26 }
 0x3bb   :  { %1116 = vrot.lane.b32.xlu1 %v968_v51, %s1948_s27  ;;  %1146 = vrot.lane.b32.xlu2 %v1136_v18, %s1949_s28 }
 0x3bd   :  { %1148 = vrot.lane.b32.xlu0 %v1137_v23, %s1949_s28 }
 0x3c3   :  { %1168 = vrot.lane.b32.xlu1 %v971_v38, %s1950_s29  ;;  %1054 = vrot.lane.b32.xlu2 %v1046_v27, %s1946_s25 }
 0x3c5   :  { %1166 = vrot.lane.b32.xlu0 %v939_v34, %s1950_s29 }
 0x3cb   :  { %1112 = vrot.lane.b32.xlu1 %v904_v20, %s1948_s27  ;;  %1144 = vrot.lane.b32.xlu2 %v1135_v43, %s1949_s28 }
 0x3cd   :  { %1164 = vrot.lane.b32.xlu0 %v907_v47, %s1950_s29 }
 0x3d3   :  { %1216 = vperm.xlu1 %1914, %v1187_v31   ;;  %1211 = vperm.xlu2 %1915, %v1186_v24  }
 0x3d5   :  { %v975_v36 = vpop.permute.xlu2 %974  ;;  %1234 = vperm.xlu0 %1913, %v1189_v52  }
 0x3db   :  { %1229 = vperm.xlu1 %1914, %v1188_v29   ;;  %1371 = vperm.xlu2 %1915, %v1191_v58  }
 0x3dd   :  { %v977_v7 = vpop.permute.xlu2 %976  ;;  %1366 = vperm.xlu0 %1913, %v1190_v5  }
 0x3de   :  { %v984_v26 = vsel %vm393_vm4, %v975_v36, %v977_v7 }
 0x3df   :  { %v987_v18 = vmul.f32 %v984_v26, %v2154_v11 }
 0x3e3   :  { %1389 = vperm.xlu1 %1914, %v1193_v19   ;;  %1384 = vperm.xlu2 %1915, %v1192_v6  }
 0x3e5   :  { %v1005_v9 = vpop.permute.xlu2 %1004 }
 0x3ed   :  { %v2496_v12 = vpop.permute.xlu2 %1090 }
 0x3ef   :  { %v1003_v55 = vpop.permute.xlu0 %1002 }
 0x3f0   :  { %v1012_v51 = vsel %vm426_vm3, %v1003_v55, %v1005_v9 }
 0x3f1   :  { %v1015_v23 = vmul.f32 %v1012_v51, %v2159_v13 }
 0x3f3   :  { %v1019_v38 = vadd.f32 %v1015_v23, %v987_v18 }
 0x3f5   :  { %v1023_v20 = vpop.permute.xlu1 %1022  ;;  %v1025_v27 = vpop.permute.xlu2 %1024 }
 0x3f6   :  { %v1032_v34 = vsel %vm451_vm5, %v1023_v20, %v1025_v27 }
 0x3f7   :  { %v1035_v43 = vmul.f32 %v1032_v34, %v2168_v21  ;;  %v979_v47 = vpop.permute.xlu0 %978 }
 0x3f9   :  { %v2507_v31 = vadd.f32 %v1035_v43, %v1019_v38 }
 0x3fd   :  { %v981_v24 = vpop.permute.xlu1 %980  ;;  %v1057_v5 = vpop.permute.xlu2 %1056 }
 0x3fe   :  { %v985_v29 = vsel %vm393_vm4, %v981_v24, %v975_v36 }
 0x3ff   :  { %v1007_v52 = vpop.permute.xlu0 %1006  ;;  %v986_v6 = vmul.f32 %v985_v29, %v2130_v61 }
 0x405   :  { %v1009_v58 = vpop.permute.xlu1 %1008  ;;  %v2517_v34 = vpop.permute.xlu2 %1110 }
 0x406   :  { %v1013_v19 = vsel %vm426_vm3, %v1009_v58, %v1003_v55 }
 0x407   :  { %v1014_v26 = vmul.f32 %v1013_v19, %v2126_v60  ;;  %v1027_v51 = vpop.permute.xlu0 %1026  ;;  %v1010_v19 = vsel %vm426_vm3, %v1007_v52, %v1009_v58 }
 0x409   :  { %v1018_v18 = vadd.f32 %v1014_v26, %v986_v6  ;;  %v982_v6 = vsel %vm393_vm4, %v979_v47, %v981_v24  ;;  %v1011_v26 = vsel %vm426_vm3, %v1005_v9, %v1007_v52 }
 0x40a   :  { %v989_v24 = vmul.f32 %v982_v6, %v2188_v39  ;;  %v1016_v9 = vmul.f32 %v1011_v26, %v2210_v50 }
 0x40d   :  { %v2515_v23 = vpop.permute.xlu1 %1142  ;;  %v2522_v55 = vpop.permute.xlu2 %1162 }
 0x40f   :  { %v1059_v38 = vpop.permute.xlu0 %1058 }
 0x415   :  { %v1029_v43 = vpop.permute.xlu1 %1028 }
 0x416   :  { %v1033_v36 = vsel %vm451_vm5, %v1029_v43, %v1023_v20  ;;  %v1030_v20 = vsel %vm451_vm5, %v1027_v51, %v1029_v43 }
 0x417   :  { %v1034_v21 = vmul.f32 %v1033_v36, %v2136_v0  ;;  %v1095_v11 = vpop.permute.xlu0 %1094  ;;  %v1017_v36 = vmul.f32 %v1010_v19, %v2184_v35  ;;  %v2539_v0 = vpop.permute.xlu2 %1146  ;;  %v1037_v52 = vmul.f32 %v1030_v20, %v2190_v40  ;;  %v1063_v19 = vsel %vm488_vm6, %v1057_v5, %v1059_v38 }
 0x418   :  { %v1068_v45 = vmul.f32 %v1063_v19, %v2228_v4 }
 0x419   :  { %v1038_v13 = vadd.f32 %v1034_v21, %v1018_v18  ;;  %v983_v21 = vsel %vm393_vm4, %v977_v7, %v979_v47  ;;  %v1031_v18 = vsel %vm451_vm5, %v1025_v27, %v1027_v51  ;;  %v1021_v47 = vadd.f32 %v1017_v36, %v989_v24 }
 0x41a   :  { %v988_v7 = vmul.f32 %v983_v21, %v2217_v56  ;;  %v1036_v27 = vmul.f32 %v1031_v18, %v2219_v59 }
 0x41b   :  { %v1041_v6 = vadd.f32 %v1037_v52, %v1021_v47 }
 0x41c   :  { %v1020_v60 = vadd.f32 %v1016_v9, %v988_v7 }
 0x41d   :  { %v1061_v29 = vpop.permute.xlu1 %1060 }
 0x41e   :  { %v1062_v58 = vsel %vm488_vm6, %v1059_v38, %v1061_v29  ;;  %v1040_v20 = vadd.f32 %v1036_v27, %v1020_v60 }
 0x41f   :  { %v2524_v61 = vpop.permute.xlu0 %1114  ;;  %v1069_v51 = vmul.f32 %v1062_v58, %v2198_v44  ;;  %v1055_v24 = vpop.permute.xlu2 %1054 }
 0x420   :  { %v1072_v21 = vadd.f32 %v1068_v45, %v1040_v20  ;;  %v1065_v7 = vsel %vm488_vm6, %v1061_v29, %v1055_v24 }
 0x421   :  { %v1073_v50 = vadd.f32 %v1069_v51, %v1041_v6 }
 0x422   :  { %v1076_v47 = vadd.f32 %v1072_v21, %v2445_v2 }
 0x423   :  { %v1077_v52 = vadd.f32 %v1073_v50, %v2453_v16  ;;  %v1064_v50 = vsel %vm488_vm6, %v1055_v24, %v1057_v5 }
 0x424   :  { %v1067_v29 = vmul.f32 %v1064_v50, %v2294_v32 }
 0x425   :  { %v1097_v43 = vpop.permute.xlu1 %1096 }
 0x426   :  { %v1101_v26 = vsel %vm529_vm7, %v1097_v43, %v2496_v12  ;;  %v1098_v38 = vsel %vm529_vm7, %v1095_v11, %v1097_v43 }
 0x427   :  { %v1093_v35 = vpop.permute.xlu0 %1092  ;;  %v1105_v36 = vmul.f32 %v1101_v26, %v2233_v8  ;;  %v1104_v60 = vmul.f32 %v1098_v38, %v2253_v28  ;;  %v1066_v38 = vmul.f32 %v1065_v7, %v2291_v25 }
 0x429   :  { %v1109_v27 = vadd.f32 %v1105_v36, %v1077_v52  ;;  %v1108_v6 = vadd.f32 %v1104_v60, %v1076_v47  ;;  %v1099_v52 = vsel %vm529_vm7, %v1093_v35, %v1095_v11  ;;  %v1100_v60 = vsel %vm529_vm7, %v2496_v12, %v1093_v35 }
 0x42d   :  { %v1117_v18 = vpop.permute.xlu1 %1116 }
 0x42e   :  { %v1118_v58 = vsel %vm554_vm8, %v2524_v61, %v1117_v18  ;;  %v1121_v9 = vsel %vm554_vm8, %v1117_v18, %v2517_v34 }
 0x42f   :  { %v1125_v19 = vmul.f32 %v1121_v9, %v2243_v15  ;;  %v1149_v43 = vpop.permute.xlu0 %1148  ;;  %v1124_v51 = vmul.f32 %v1118_v58, %v2263_v46  ;;  %v1070_v9 = vadd.f32 %v1066_v38, %v1038_v13  ;;  %v1103_v13 = vmul.f32 %v1099_v52, %v2309_v63 }
 0x430   :  { %v1153_v45 = vsel %vm591_vm10, %v1149_v43, %v2515_v23  ;;  %v1150_v16 = vsel %vm591_vm10, %v2539_v0, %v1149_v43  ;;  %v1071_v43 = vadd.f32 %v1067_v29, %v2507_v31 }
 0x431   :  { %v1129_v26 = vadd.f32 %v1125_v19, %v1109_v27  ;;  %v1157_v20 = vmul.f32 %v1153_v45, %v2258_v37  ;;  %v1128_v18 = vadd.f32 %v1124_v51, %v1108_v6  ;;  %v1156_v2 = vmul.f32 %v1150_v16, %v2278_v33  ;;  %v1145_v27 = vpop.permute.xlu2 %1144 }
 0x432   :  { %v1102_v51 = vmul.f32 %v1100_v60, %v2306_v62  ;;  %v1074_v50 = vadd.f32 %v1070_v9, %v2433_v42  ;;  %v1075_v35 = vadd.f32 %v1071_v43, %v2456_v3  ;;  %v1151_v31 = vsel %vm591_vm10, %v1145_v27, %v2539_v0 }
 0x433   :  { %v1161_v36 = vadd.f32 %v1157_v20, %v1129_v26  ;;  %v1160_v45 = vadd.f32 %v1156_v2, %v1128_v18  ;;  %v1152_v16 = vsel %vm591_vm10, %v2515_v23, %v1145_v27  ;;  %v1155_v18 = vmul.f32 %v1151_v31, %v2342_v22 }
 0x434   :  { %v1106_v26 = vadd.f32 %v1102_v51, %v1074_v50  ;;  %v1107_v3 = vadd.f32 %v1103_v13, %v1075_v35 }
 0x435   :  { %v1169_v21 = vpop.permute.xlu1 %1168 }
 0x436   :  { %v1173_v5 = vsel %vm616_vm9, %v1169_v21, %v2522_v55 }
 0x437   :  { %v1177_v24 = vmul.f32 %v1173_v5, %v2265_v48  ;;  %v1167_v58 = vpop.permute.xlu0 %1166 }
 0x438   :  { %v1170_v19 = vsel %vm616_vm9, %v1167_v58, %v1169_v21 }
 0x439   :  { %v1181_v7 = vadd.f32 %v1177_v24, %v1161_v36  ;;  %v1176_v47 = vmul.f32 %v1170_v19, %v2286_v17  ;;  %v1212_v27 = vpop.permute.xlu2 %1211 }
 0x43a   :  { %v1222_v50 = vmul.f32 %v2328_v14, %v1212_v27  ;;  %v1194_v14 = vld [vmem:[%s2869_s3 + $0x20] sm:$0xff] }
 0x43b   :  { %1185 = vst [vmem:[#allocation2 + $0x38] sm:$0xf] %v1181_v7  ;;  %v1180_v11 = vadd.f32 %v1176_v47, %v1160_v45 }
 0x43d   :  { %1184 = vst [vmem:[#allocation2 + $0x28] sm:$0xf] %v1180_v11  ;;  %v1113_v12 = vpop.permute.xlu1 %1112  ;;  %v1221_v11 = vmul.f32 %v2359_v54, %v1212_v27 }
 0x43e   :  { %v1119_v6 = vsel %vm554_vm8, %v1113_v12, %v2524_v61  ;;  %v1120_v42 = vsel %vm554_vm8, %v2517_v34, %v1113_v12  ;;  %v1154_v61 = vmul.f32 %v1152_v16, %v2326_v10 }
 0x43f   :  { %v1122_v20 = vmul.f32 %v1120_v42, %v2312_v1  ;;  %v1123_v38 = vmul.f32 %v1119_v6, %v2315_v30  ;;  %v1165_v29 = vpop.permute.xlu0 %1164  ;;  %v1219_v6 = vmul.f32 %v2379_v41, %v1212_v27  ;;  %v2890_v42 = vld [vmem:[#allocation14_spill] sm:$0xff] }
 0x440   :  { %v1171_v0 = vsel %vm616_vm9, %v1165_v29, %v1167_v58  ;;  %v1172_v23 = vsel %vm616_vm9, %v2522_v55, %v1165_v29 }
 0x441   :  { %v1126_v2 = vadd.f32 %v1122_v20, %v1106_v26  ;;  %v1127_v34 = vadd.f32 %v1123_v38, %v1107_v3  ;;  %v1174_v36 = vmul.f32 %v1172_v23, %v2353_v49  ;;  %v1175_v24 = vmul.f32 %v1171_v0, %v2357_v53 }
 0x442   :  { %v1208_v19 = vld [vmem:[#allocation2 + $0x38] sm:$0xf]  ;;  %v1220_v26 = vmul.f32 %v2890_v42, %v1212_v27 }
 0x443   :  { %v1158_v21 = vadd.f32 %v1154_v61, %v1126_v2  ;;  %v1159_v5 = vadd.f32 %v1155_v18, %v1127_v34 }
 0x444   :  { %v1207_v9 = vld [vmem:[#allocation2 + $0x28] sm:$0xf] }
 0x445   :  { %v1178_v52 = vadd.f32 %v1174_v36, %v1158_v21  ;;  %v1179_v60 = vadd.f32 %v1175_v24, %v1159_v5  ;;  %v1217_v58 = vpop.permute.xlu1 %1216  ;;  %v1195_v5 = vld [vmem:[%s2869_s3 + $0x28] sm:$0xff]  ;;  %v1372_v36 = vpop.permute.xlu2 %1371 }
 0x446   :  { %v1225_v43 = vmul.f32 %v1217_v58, %v1207_v9  ;;  %v1226_v45 = vmul.f32 %v1217_v58, %v1208_v19 }
 0x447   :  { %1182 = vst [vmem:[#allocation2 + $0x8] sm:$0xf] %v1178_v52  ;;  %v1235_v55 = vpop.permute.xlu0 %1234 }
 0x448   :  { %1183 = vst [vmem:[#allocation2 + $0x20] sm:$0xf] %v1179_v60  ;;  %v1243_v7 = vadd.f32 %v1235_v55, %v1225_v43  ;;  %v1244_v47 = vadd.f32 %v1235_v55, %v1226_v45 }
 0x44a   :  { %v1251_v51 = vmax.f32 %v1243_v7, 0.0  ;;  %v1252_v13 = vmax.f32 %v1244_v47, 0.0 }
 0x44c   :  { %1875 = vmatpush.msk.msra.mxu2 %vm90_vm0, %v1251_v51  ;;  %1878 = vmatpush.msk.msra.mxu3 %vm90_vm0, %v1252_v13 }
 0x44d   :  { %v1230_v35 = vpop.permute.xlu1 %1229  ;;  %v1385_v43 = vpop.permute.xlu2 %1384 }
 0x44e   :  { %v1205_v12 = vld [vmem:[#allocation2 + $0x8] sm:$0xf]  ;;  %v1239_v31 = vadd.f32 %v1230_v35, %v1221_v11  ;;  %v1240_v16 = vadd.f32 %v1230_v35, %v1222_v50  ;;  %v1237_v23 = vadd.f32 %v1230_v35, %v1219_v6  ;;  %v1238_v18 = vadd.f32 %v1230_v35, %v1220_v26 }
 0x44f   :  { %v1206_v3 = vld [vmem:[#allocation2 + $0x20] sm:$0xf]  ;;  %v1223_v20 = vmul.f32 %v1217_v58, %v1205_v12 }
 0x450   :  { %v1224_v38 = vmul.f32 %v1217_v58, %v1206_v3  ;;  %v1247_v29 = vmax.f32 %v1239_v31, 0.0  ;;  %v1248_v0 = vmax.f32 %v1240_v16, 0.0  ;;  %v1245_v34 = vmax.f32 %v1237_v23, 0.0  ;;  %v1367_v58 = vpop.permute.xlu0 %1366 }
 0x451   :  { %v1241_v54 = vadd.f32 %v1235_v55, %v1223_v20  ;;  %v1246_v21 = vmax.f32 %v1238_v18, 0.0  ;;  %v1196_v18 = vld [vmem:[%s2870_s4 + $0x48] sm:$0xff] }
 0x452   :  { %v1242_v61 = vadd.f32 %v1235_v55, %v1224_v38  ;;  %1333 = vmatpush.msra.mxu2 %v1247_v29  ;;  %1356 = vmatpush.msra.mxu3 %v1248_v0 }
 0x453   :  { %v1249_v2 = vmax.f32 %v1241_v54, 0.0  ;;  %1876 = vmatmul.msk.f32.vlgmr.msra.gmra.mxu2 %vm1253_vm12, %v1194_v14  ;;  %1879 = vmatmul.msk.f32.vlgmr.msra.gmra.mxu3 %vm1253_vm12, %v1194_v14 }
 0x454   :  { %v1250_v41 = vmax.f32 %v1242_v61, 0.0 }
 0x455   :  { %1869 = vmatpush.msk.msra.mxu0 %vm90_vm0, %v1249_v2  ;;  %v1390_v11 = vpop.permute.xlu1 %1389 }
 0x456   :  { %1872 = vmatpush.msk.msra.mxu1 %vm90_vm0, %v1250_v41 }
 0x457   :  { %1287 = vmatpush.msra.mxu0 %v1245_v34 }
 0x458   :  { %1310 = vmatpush.msra.mxu1 %v1246_v21  ;;  %1870 = vmatmul.msk.f32.vlgmr.msra.gmra.mxu0 %vm1253_vm12, %v1194_v14  ;;  %v1197_v21 = vld [vmem:[%s2870_s4 + $0x50] sm:$0xff] }
 0x459   :  { %1873 = vmatmul.msk.f32.vlgmr.msra.gmra.mxu1 %vm1253_vm12, %v1194_v14 }
 0x45b   :  { %1877 = vmatmul.msk.f32.gmra.mxu2 %vm1253_vm12, %v1195_v5  ;;  %1880 = vmatmul.msk.f32.gmra.mxu3 %vm1253_vm12, %v1195_v5 }
 0x460   :  { %1871 = vmatmul.msk.f32.gmra.mxu0 %vm1253_vm12, %v1195_v5 }
 0x461   :  { %1874 = vmatmul.msk.f32.gmra.mxu1 %vm1253_vm12, %v1195_v5  ;;  %v1198_v5 = vld [vmem:[%s2870_s4 + $0x58] sm:$0xff] }
 0x4d5   :  { %v1289_v24 = vpop.f32.mrf.mxu0 }
 0x4d6   :  { %v1312_v9 = vpop.f32.mrf.mxu1  ;;  %v1335_v52 = vpop.f32.mrf.mxu2  ;;  %v1374_v19 = vmul.f32 %v1367_v58, %v1289_v24  ;;  %v1200_v24 = vld [vmem:[%s2870_s4 + $0x68] sm:$0xf] }
 0x4d7   :  { %v1358_v60 = vpop.f32.mrf.mxu3  ;;  %v1375_v45 = vmul.f32 %v1367_v58, %v1312_v9  ;;  %v1376_v7 = vmul.f32 %v1367_v58, %v1335_v52 }
 0x4d8   :  { %v1377_v47 = vmul.f32 %v1367_v58, %v1358_v60  ;;  %v1392_v31 = vadd.f32 %v1385_v43, %v1374_v19 }
 0x4d9   :  { %v1393_v42 = vadd.f32 %v1385_v43, %v1375_v45  ;;  %v1394_v20 = vadd.f32 %v1385_v43, %v1376_v7 }
 0x4da   :  { %v1395_v38 = vadd.f32 %v1385_v43, %v1377_v47  ;;  %v1400_v23 = vmax.f32 %v1392_v31, 0.0 }
 0x4db   :  { %v1401_v2 = vmax.f32 %v1393_v42, 0.0  ;;  %v1402_v41 = vmax.f32 %v1394_v20, 0.0 }
 0x4dc   :  { %v1403_v34 = vmax.f32 %v1395_v38, 0.0 }
 0x4dd   :  { %v1292_v55 = vpop.f32.mrf.mxu0 }
 0x4de   :  { %v1378_v27 = vmul.f32 %v1372_v36, %v1292_v55  ;;  %v1315_v51 = vpop.f32.mrf.mxu1  ;;  %v1338_v13 = vpop.f32.mrf.mxu2 }
 0x4df   :  { %v1379_v50 = vmul.f32 %v1372_v36, %v1315_v51  ;;  %v1380_v35 = vmul.f32 %v1372_v36, %v1338_v13  ;;  %v1361_v12 = vpop.f32.mrf.mxu3 }
 0x4e0   :  { %v1396_v16 = vadd.f32 %v1390_v11, %v1378_v27  ;;  %v1381_v6 = vmul.f32 %v1372_v36, %v1361_v12  ;;  %v1199_v36 = vld [vmem:[%s2870_s4 + $0x60] sm:$0xff]  ;;  %s1951_s4 = smov [#allocation3]  }
 0x4e1   :  { %v1397_v26 = vadd.f32 %v1390_v11, %v1379_v50  ;;  %v1398_v3 = vadd.f32 %v1390_v11, %v1380_v35 }
 0x4e2   :  { %v1404_v29 = vmax.f32 %v1396_v16, 0.0  ;;  %v1399_v0 = vadd.f32 %v1390_v11, %v1381_v6 }
 0x4e3   :  { %v1405_v14 = vmax.f32 %v1397_v26, 0.0  ;;  %v1406_v54 = vmax.f32 %v1398_v3, 0.0 }
 0x4e4   :  { %v1407_v61 = vmax.f32 %v1399_v0, 0.0  ;;  %1437 = vmatpush.msrb.mxu0 %v1404_v29 }
 0x4e5   :  { %1469 = vmatpush.msrb.mxu1 %v1405_v14  ;;  %1501 = vmatpush.msrb.mxu2 %v1406_v54 }
 0x4e6   :  { %1533 = vmatpush.msrb.mxu3 %v1407_v61  ;;  %1438 = vmatpush.msrb.mxu0 %v1400_v23 }
 0x4e7   :  { %1470 = vmatpush.msrb.mxu1 %v1401_v2  ;;  %1881 = vmatmul.msk.f32.vlgmr.msrb.gmra.mxu0 %vm239_vm2, %v1196_v18 }
 0x4e8   :  { %1502 = vmatpush.msrb.mxu2 %v1402_v41  ;;  %1534 = vmatpush.msrb.mxu3 %v1403_v34 }
 0x4e9   :  { %1886 = vmatmul.msk.f32.vlgmr.msrb.gmra.mxu1 %vm239_vm2, %v1196_v18  ;;  %1891 = vmatmul.msk.f32.vlgmr.msrb.gmra.mxu2 %vm239_vm2, %v1196_v18 }
 0x4ea   :  { %1896 = vmatmul.msk.f32.vlgmr.msrb.gmra.mxu3 %vm239_vm2, %v1196_v18 }
 0x4ef   :  { %1882 = vmatmul.msk.f32.gmra.mxu0 %vm239_vm2, %v1197_v21 }
 0x4f1   :  { %1887 = vmatmul.msk.f32.gmra.mxu1 %vm239_vm2, %v1197_v21  ;;  %1892 = vmatmul.msk.f32.gmra.mxu2 %vm239_vm2, %v1197_v21 }
 0x4f2   :  { %1897 = vmatmul.msk.f32.gmra.mxu3 %vm239_vm2, %v1197_v21 }
 0x4f7   :  { %1883 = vmatmul.msk.f32.gmra.mxu0 %vm239_vm2, %v1198_v5 }
 0x4f9   :  { %1888 = vmatmul.msk.f32.gmra.mxu1 %vm239_vm2, %v1198_v5  ;;  %1893 = vmatmul.msk.f32.gmra.mxu2 %vm239_vm2, %v1198_v5 }
 0x4fa   :  { %1898 = vmatmul.msk.f32.gmra.mxu3 %vm239_vm2, %v1198_v5 }
 0x4ff   :  { %1884 = vmatmul.msk.f32.gmra.mxu0 %vm239_vm2, %v1199_v36 }
 0x501   :  { %1889 = vmatmul.msk.f32.gmra.mxu1 %vm239_vm2, %v1199_v36  ;;  %1894 = vmatmul.msk.f32.gmra.mxu2 %vm239_vm2, %v1199_v36 }
 0x502   :  { %1899 = vmatmul.msk.f32.gmra.mxu3 %vm239_vm2, %v1199_v36 }
 0x507   :  { %1885 = vmatmul.msk.f32.gmra.mxu0 %vm239_vm2, %v1200_v24 }
 0x509   :  { %1895 = vmatmul.msk.f32.gmra.mxu2 %vm239_vm2, %v1200_v24  ;;  %1890 = vmatmul.msk.f32.gmra.mxu1 %vm239_vm2, %v1200_v24 }
 0x50a   :  { %1900 = vmatmul.msk.f32.gmra.mxu3 %vm239_vm2, %v1200_v24 }
 0x564   :  { %v1440_v9 = vpop.f32.mrf.mxu0 }
 0x565   :  { %v1571_v52 = vrot.slane %v1440_v9, 4  ;;  %1551 = vrot.lane.b32.xlu0 %v1440_v9, %s1943_s22 }
 0x566   :  { %v1472_v60 = vpop.f32.mrf.mxu1 }
 0x567   :  { %1579 = vrot.lane.b32.xlu1 %v1571_v52, %s1944_s23  ;;  %v1572_v43 = vrot.slane %v1472_v60, 4 }
 0x56c   :  { %v1443_v58 = vpop.f32.mrf.mxu0  ;;  %v1504_v47 = vpop.f32.mrf.mxu2 }
 0x56d   :  { %v1623_v19 = vrot.slane %v1443_v58, 4  ;;  %1599 = vrot.lane.b32.xlu2 %v1443_v58, %s1945_s24  ;;  %v1536_v27 = vpop.f32.mrf.mxu3  ;;  %v1573_v11 = vrot.slane %v1504_v47, 4 }
 0x56e   :  { %v1475_v55 = vpop.f32.mrf.mxu1  ;;  %v1574_v50 = vrot.slane %v1536_v27, 4 }
 0x56f   :  { %1553 = vrot.lane.b32.xlu1 %v1472_v60, %s1943_s22  ;;  %1631 = vrot.lane.b32.xlu0 %v1623_v19, %s1946_s25  ;;  %v1624_v51 = vrot.slane %v1475_v55, 4 }
 0x574   :  { %v2685_v45 = vpop.f32.mrf.mxu0  ;;  %v1507_v16 = vpop.f32.mrf.mxu2 }
 0x575   :  { %v1659_v7 = vrot.slane %v2685_v45, 4  ;;  %1581 = vrot.lane.b32.xlu2 %v1572_v43, %s1944_s23  ;;  %v1539_v6 = vpop.f32.mrf.mxu3  ;;  %v1625_v38 = vrot.slane %v1507_v16, 4 }
 0x576   :  { %v2695_v35 = vpop.f32.mrf.mxu1  ;;  %v1626_v42 = vrot.slane %v1539_v6, 4 }
 0x577   :  { %1601 = vrot.lane.b32.xlu0 %v1475_v55, %s1945_s24  ;;  %1667 = vrot.lane.b32.xlu1 %v1659_v7, %s1947_s26  ;;  %v1660_v12 = vrot.slane %v2695_v35, 4  ;;  %v2891_v7 = vld [vmem:[#allocation10_spill] sm:$0xff] }
 0x57c   :  { %v1449_v13 = vpop.f32.mrf.mxu0  ;;  %v2708_v0 = vpop.f32.mrf.mxu2 }
 0x57d   :  { %1555 = vrot.lane.b32.xlu2 %v1504_v47, %s1943_s22  ;;  %v1711_v31 = vrot.slane %v1449_v13, 4  ;;  %v2706_v20 = vpop.f32.mrf.mxu3  ;;  %v1661_v23 = vrot.slane %v2708_v0, 4 }
 0x57e   :  { %v1481_v3 = vpop.f32.mrf.mxu1  ;;  %v1662_v54 = vrot.slane %v2706_v20, 4 }
 0x57f   :  { %1557 = vrot.lane.b32.xlu0 %v1536_v27, %s1943_s22  ;;  %1633 = vrot.lane.b32.xlu1 %v1624_v51, %s1946_s25  ;;  %v1712_v29 = vrot.slane %v1481_v3, 4  ;;  %v2892_v27 = vld [vmem:[#allocation9_spill] sm:$0xff]  ;;  %s1795_s22 = sshll.u32 %s1951_s4, 4  ;;  %s1796_s22 = int_to_ptr.vmem [resolvable:$true] %s1795_s22 }
 0x584   :  { %v1452_v26 = vpop.f32.mrf.mxu0  ;;  %v1513_v61 = vpop.f32.mrf.mxu2 }
 0x585   :  { %1687 = vrot.lane.b32.xlu2 %v1449_v13, %s1948_s27  ;;  %v1545_v14 = vpop.f32.mrf.mxu3  ;;  %v1713_v18 = vrot.slane %v1513_v61, 4 }
 0x586   :  { %v1714_v2 = vrot.slane %v1545_v14, 4  ;;  %v1484_v41 = vpop.f32.mrf.mxu1 }
 0x587   :  { %1583 = vrot.lane.b32.xlu0 %v1573_v11, %s1944_s23  ;;  %1585 = vrot.lane.b32.xlu1 %v1574_v50, %s1944_s23 }
 0x58c   :  { %v1516_v34 = vpop.f32.mrf.mxu2 }
 0x58d   :  { %1669 = vrot.lane.b32.xlu2 %v1660_v12, %s1947_s26  ;;  %v1548_v21 = vpop.f32.mrf.mxu3 }
 0x58f   :  { %1603 = vrot.lane.b32.xlu1 %v1507_v16, %s1945_s24  ;;  %1719 = vrot.lane.b32.xlu0 %v1711_v31, %s1949_s28  ;;  %v2893_v16 = vld [vmem:[#allocation11_spill] sm:$0xff] }
 0x595   :  { %1605 = vrot.lane.b32.xlu2 %v1539_v6, %s1945_s24 }
 0x597   :  { %1637 = vrot.lane.b32.xlu0 %v1626_v42, %s1946_s25  ;;  %1739 = vrot.lane.b32.xlu1 %v1452_v26, %s1950_s29 }
 0x59d   :  { %1635 = vrot.lane.b32.xlu2 %v1625_v38, %s1946_s25  ;;  %s1797_s25 = sshll.u32 %s2871_s5, 4  ;;  %s1798_s25 = int_to_ptr.hbm [resolvable:$true] %s1797_s25 }
 0x59f   :  { %1689 = vrot.lane.b32.xlu0 %v1481_v3, %s1948_s27  ;;  %1721 = vrot.lane.b32.xlu1 %v1712_v29, %s1949_s28 }
 0x5a5   :  { %1693 = vrot.lane.b32.xlu2 %v1545_v14, %s1948_s27 }
 0x5a7   :  { %1671 = vrot.lane.b32.xlu0 %v1661_v23, %s1947_s26  ;;  %1673 = vrot.lane.b32.xlu1 %v1662_v54, %s1947_s26  ;;  %s1952_s26 = smov 512  }
 0x5ad   :  { %1723 = vrot.lane.b32.xlu2 %v1713_v18, %s1949_s28 }
 0x5af   :  { %1725 = vrot.lane.b32.xlu0 %v1714_v2, %s1949_s28  ;;  %1691 = vrot.lane.b32.xlu1 %v1513_v61, %s1948_s27  ;;  %s1953_s27 = smov 32  }
 0x5b5   :  { %1741 = vrot.lane.b32.xlu2 %v1484_v41, %s1950_s29 }
 0x5b7   :  { %1743 = vrot.lane.b32.xlu0 %v1516_v34, %s1950_s29  ;;  %1745 = vrot.lane.b32.xlu1 %v1548_v21, %s1950_s29  ;;  %v2894_v34 = vld [vmem:[#allocation6_spill] sm:$0xff] }
 0x5c7   :  { %v1600_v5 = vpop.permute.xlu2 %1599 }
 0x5cf   :  { %v1582_v36 = vpop.permute.xlu2 %1581 }
 0x5d7   :  { %v1556_v24 = vpop.permute.xlu2 %1555  ;;  %v1552_v9 = vpop.permute.xlu0 %1551 }
 0x5d9   :  { %v1580_v52 = vpop.permute.xlu1 %1579 }
 0x5da   :  { %v1589_v60 = vsel %vm426_vm3, %v1580_v52, %v1582_v36 }
 0x5db   :  { %v1592_v47 = vmul.f32 %v1589_v60, %v2891_v7  ;;  %v2895_v60 = vld [vmem:[#allocation7_spill] sm:$0xff] }
 0x5df   :  { %v2726_v58 = vpop.permute.xlu2 %1687 }
 0x5e1   :  { %v1554_v19 = vpop.permute.xlu1 %1553  ;;  %v2728_v43 = vpop.permute.xlu0 %1631 }
 0x5e2   :  { %v1561_v55 = vsel %vm393_vm4, %v1552_v9, %v1554_v19 }
 0x5e3   :  { %v1564_v51 = vmul.f32 %v1561_v55, %v2892_v27 }
 0x5e5   :  { %v1596_v13 = vadd.f32 %v1592_v47, %v1564_v51  ;;  %v2896_v51 = vld [vmem:[#allocation8_spill] sm:$0xff] }
 0x5e7   :  { %v2734_v11 = vpop.permute.xlu2 %1669 }
 0x5e9   :  { %v1602_v50 = vpop.permute.xlu0 %1601  ;;  %v2736_v12 = vpop.permute.xlu1 %1667 }
 0x5ea   :  { %v1609_v31 = vsel %vm451_vm5, %v1600_v5, %v1602_v50 }
 0x5eb   :  { %v1612_v6 = vmul.f32 %v1609_v31, %v2893_v16 }
 0x5ed   :  { %v2741_v42 = vadd.f32 %v1612_v6, %v1596_v13 }
 0x5ef   :  { %v1606_v26 = vpop.permute.xlu2 %1605 }
 0x5f0   :  { %v1610_v7 = vsel %vm451_vm5, %v1606_v26, %v1600_v5  ;;  %v1677_v5 = vsel %vm529_vm7, %v2736_v12, %v2734_v11 }
 0x5f1   :  { %v1558_v3 = vpop.permute.xlu0 %1557  ;;  %v1634_v38 = vpop.permute.xlu1 %1633  ;;  %v1611_v13 = vmul.f32 %v1610_v7, %v2896_v51 }
 0x5f2   :  { %v1562_v41 = vsel %vm393_vm4, %v1558_v3, %v1552_v9 }
 0x5f3   :  { %v1563_v55 = vmul.f32 %v1562_v41, %v2895_v60  ;;  %v2897_v60 = vld [vmem:[#allocation12_spill] sm:$0xff] }
 0x5f7   :  { %v1636_v29 = vpop.permute.xlu2 %1635 }
 0x5f9   :  { %v1584_v14 = vpop.permute.xlu0 %1583  ;;  %v1586_v54 = vpop.permute.xlu1 %1585 }
 0x5fa   :  { %v1590_v61 = vsel %vm426_vm3, %v1586_v54, %v1580_v52 }
 0x5fb   :  { %v1591_v21 = vmul.f32 %v1590_v61, %v2894_v34  ;;  %v1587_v61 = vsel %vm426_vm3, %v1584_v14, %v1586_v54  ;;  %v1559_v34 = vsel %vm393_vm4, %v1556_v24, %v1558_v3 }
 0x5fc   :  { %v1566_v51 = vmul.f32 %v1559_v34, %v2188_v39 }
 0x5fd   :  { %v1595_v47 = vadd.f32 %v1591_v21, %v1563_v55  ;;  %v1594_v55 = vmul.f32 %v1587_v61, %v2897_v60 }
 0x5ff   :  { %v2743_v23 = vpop.permute.xlu2 %1693  ;;  %v1615_v9 = vadd.f32 %v1611_v13, %v1595_v47  ;;  %v1679_v47 = vmul.f32 %v1677_v5, %v2306_v62 }
 0x601   :  { %v1604_v18 = vpop.permute.xlu1 %1603  ;;  %v2747_v2 = vpop.permute.xlu0 %1719 }
 0x602   :  { %v1607_v21 = vsel %vm451_vm5, %v1604_v18, %v1606_v26  ;;  %v1560_v26 = vsel %vm393_vm4, %v1554_v19, %v1556_v24  ;;  %v1608_v24 = vsel %vm451_vm5, %v1602_v50, %v1604_v18  ;;  %v2898_v19 = vld [vmem:[#allocation13_spill] sm:$0xff] }
 0x603   :  { %v1614_v13 = vmul.f32 %v1607_v21, %v2190_v40  ;;  %v1565_v34 = vmul.f32 %v1560_v26, %v2217_v56  ;;  %v1698_v56 = vsel %vm554_vm8, %v2743_v23, %v2726_v58 }
 0x604   :  { %v1702_v26 = vmul.f32 %v1698_v56, %v2243_v15 }
 0x607   :  { %v2755_v27 = vpop.permute.xlu2 %1723 }
 0x609   :  { %v1638_v31 = vpop.permute.xlu0 %1637  ;;  %v2758_v52 = vpop.permute.xlu1 %1739 }
 0x60a   :  { %v1642_v16 = vsel %vm488_vm6, %v1638_v31, %v2728_v43 }
 0x60b   :  { %v1643_v6 = vmul.f32 %v1642_v16, %v2291_v25  ;;  %v1639_v25 = vsel %vm488_vm6, %v1636_v29, %v1638_v31  ;;  %v1598_v31 = vadd.f32 %v1594_v55, %v1566_v51 }
 0x60c   :  { %v1646_v39 = vmul.f32 %v1639_v25, %v2198_v44  ;;  %v1641_v44 = vsel %vm488_vm6, %v2728_v43, %v1634_v38 }
 0x60d   :  { %v1647_v41 = vadd.f32 %v1643_v6, %v1615_v9  ;;  %v1588_v9 = vsel %vm426_vm3, %v1582_v36, %v1584_v14  ;;  %v1618_v61 = vadd.f32 %v1614_v13, %v1598_v31 }
 0x60e   :  { %v1593_v14 = vmul.f32 %v1588_v9, %v2898_v19 }
 0x60f   :  { %v1651_v7 = vadd.f32 %v1647_v41, %v2685_v45  ;;  %v2778_v54 = vpop.permute.xlu2 %1741  ;;  %v1650_v50 = vadd.f32 %v1646_v39, %v1618_v61 }
 0x610   :  { %v1749_v36 = vsel %vm616_vm9, %v2758_v52, %v2778_v54  ;;  %v1597_v60 = vadd.f32 %v1593_v14, %v1565_v34 }
 0x611   :  { %v1690_v16 = vpop.permute.xlu0 %1689  ;;  %v1722_v3 = vpop.permute.xlu1 %1721  ;;  %v1683_v40 = vadd.f32 %v1679_v47, %v1651_v7  ;;  %v1751_v21 = vmul.f32 %v1749_v36, %v2353_v49  ;;  %v1644_v47 = vmul.f32 %v1641_v44, %v2294_v32  ;;  %v1654_v51 = vadd.f32 %v1650_v50, %v2706_v20 }
 0x612   :  { %v1697_v45 = vsel %vm554_vm8, %v2726_v58, %v1690_v16  ;;  %v1729_v62 = vsel %vm591_vm10, %v2747_v2, %v1722_v3 }
 0x613   :  { %v1699_v6 = vmul.f32 %v1697_v45, %v2312_v1  ;;  %v1731_v5 = vmul.f32 %v1729_v62, %v2326_v10  ;;  %v1613_v1 = vmul.f32 %v1608_v24, %v2219_v59  ;;  %v1640_v10 = vsel %vm488_vm6, %v1634_v38, %v1636_v29 }
 0x614   :  { %v1645_v32 = vmul.f32 %v1640_v10, %v2228_v4  ;;  %v1648_v29 = vadd.f32 %v1644_v47, %v2741_v42 }
 0x615   :  { %v1703_v41 = vadd.f32 %v1699_v6, %v1683_v40  ;;  %v1617_v43 = vadd.f32 %v1613_v1, %v1597_v60 }
 0x616   :  { %v1652_v15 = vadd.f32 %v1648_v29, %v2695_v35  ;;  %v1728_v35 = vsel %vm591_vm10, %v1722_v3, %v2755_v27 }
 0x617   :  { %v1735_v18 = vadd.f32 %v1731_v5, %v1703_v41  ;;  %v1649_v9 = vadd.f32 %v1645_v32, %v1617_v43 }
 0x619   :  { %v1755_v55 = vadd.f32 %v1751_v21, %v1735_v18  ;;  %v1672_v7 = vpop.permute.xlu0 %1671  ;;  %v1674_v25 = vpop.permute.xlu1 %1673  ;;  %v1653_v39 = vadd.f32 %v1649_v9, %v2708_v0 }
 0x61a   :  { %v1678_v59 = vsel %vm529_vm7, %v1674_v25, %v2736_v12  ;;  %v1676_v38 = vsel %vm529_vm7, %v2734_v11, %v1672_v7  ;;  %v1675_v12 = vsel %vm529_vm7, %v1672_v7, %v1674_v25 }
 0x61b   :  { %v1763_v49 = vrot.slane %v1755_v55, 4  ;;  %v1682_v13 = vmul.f32 %v1678_v59, %v2233_v8  ;;  %v1680_v20 = vmul.f32 %v1676_v38, %v2309_v63  ;;  %v1681_v8 = vmul.f32 %v1675_v12, %v2253_v28 }
 0x61d   :  { %1771 = vst [vmem:[#allocation2 + $0x8] sm:$0xf0] %v1763_v49  ;;  %v1686_v58 = vadd.f32 %v1682_v13, %v1654_v51  ;;  %v1684_v6 = vadd.f32 %v1680_v20, %v1652_v15 }
 0x61f   :  { %v1706_v45 = vadd.f32 %v1702_v26, %v1686_v58 }
 0x621   :  { %v1726_v4 = vpop.permute.xlu0 %1725  ;;  %v1692_v62 = vpop.permute.xlu1 %1691 }
 0x622   :  { %v1730_v11 = vsel %vm591_vm10, %v1726_v4, %v2747_v2  ;;  %v1695_v42 = vsel %vm554_vm8, %v1692_v62, %v2743_v23  ;;  %v1696_v31 = vsel %vm554_vm8, %v1690_v16, %v1692_v62  ;;  %v1685_v2 = vadd.f32 %v1681_v8, %v1653_v39 }
 0x623   :  { %v1700_v63 = vmul.f32 %v1696_v31, %v2315_v30  ;;  %v1701_v28 = vmul.f32 %v1695_v42, %v2263_v46  ;;  %v1734_v24 = vmul.f32 %v1730_v11, %v2258_v37  ;;  %v1727_v23 = vsel %vm591_vm10, %v2755_v27, %v1726_v4 }
 0x624   :  { %v1779_v40 = vld [vmem:[#allocation2 + $0x8] sm:$0xff]  ;;  %v1732_v30 = vmul.f32 %v1728_v35, %v2342_v22  ;;  %v1733_v46 = vmul.f32 %v1727_v23, %v2278_v33 }
 0x625   :  { %1787 = vst [vmem:[#allocation3 + $0x20] sm:$0xff] %v1779_v40  ;;  %v1704_v16 = vadd.f32 %v1700_v63, %v1684_v6  ;;  %v1705_v0 = vadd.f32 %v1701_v28, %v1685_v2  ;;  %v1738_v36 = vadd.f32 %v1734_v24, %v1706_v45 }
 0x627   :  { %v1736_v61 = vadd.f32 %v1732_v30, %v1704_v16  ;;  %v1737_v22 = vadd.f32 %v1733_v46, %v1705_v0 }
 0x629   :  { %v1744_v19 = vpop.permute.xlu0 %1743  ;;  %v1746_v14 = vpop.permute.xlu1 %1745 }
 0x62a   :  { %v1748_v3 = vsel %vm616_vm9, %v2778_v54, %v1744_v19  ;;  %v1747_v37 = vsel %vm616_vm9, %v1744_v19, %v1746_v14  ;;  %v1750_v27 = vsel %vm616_vm9, %v1746_v14, %v2758_v52 }
 0x62b   :  { %v1752_v41 = vmul.f32 %v1748_v3, %v2357_v53  ;;  %v1753_v33 = vmul.f32 %v1747_v37, %v2286_v17  ;;  %v1754_v5 = vmul.f32 %v1750_v27, %v2265_v48 }
 0x62d   :  { %v1756_v34 = vadd.f32 %v1752_v41, %v1736_v61  ;;  %v1757_v44 = vadd.f32 %v1753_v33, %v1737_v22  ;;  %v1758_v1 = vadd.f32 %v1754_v5, %v1738_v36 }
 0x62f   :  { %v1764_v50 = vrot.slane %v1756_v34, 4  ;;  %v1765_v18 = vrot.slane %v1757_v44, 4  ;;  %v1766_v54 = vrot.slane %v1758_v1, 4 }
 0x631   :  { %1772 = vst [vmem:[#allocation2 + $0x20] sm:$0xf0] %v1764_v50 }
 0x632   :  { %1773 = vst [vmem:[#allocation2 + $0x28] sm:$0xf0] %v1765_v18 }
 0x633   :  { %1774 = vst [vmem:[#allocation2 + $0x38] sm:$0xf0] %v1766_v54 }
 0x638   :  { %v1780_v57 = vld [vmem:[#allocation2 + $0x20] sm:$0xff] }
 0x639   :  { %1788 = vst [vmem:[#allocation3 + $0x28] sm:$0xff] %v1780_v57  ;;  %v1781_v48 = vld [vmem:[#allocation2 + $0x28] sm:$0xff] }
 0x63a   :  { %v1782_v17 = vld [vmem:[#allocation2 + $0x38] sm:$0xff]  ;;  %1789 = vst [vmem:[#allocation3 + $0x30] sm:$0xff] %v1781_v48 }
 0x63b   :  { %1790 = vst [vmem:[#allocation3 + $0x38] sm:$0xff] %v1782_v17 }
 0x63c   :  { %1803 = dma.vmem_to_hbm [thread:$0]  %s1796_s22, 1024, %s1798_s25, [#allocation4], %s1952_s26, %s1952_s26, %s1953_s27  }
 0x63d   :  { %1940 = dma.done.wait [#allocation4], 1024  }
 0x63e   :  { %1941 = vsyncadd [#allocation4], 4294966272 }
 0x63f   :  { %1808 = vsyncpa [#allocation4], 1 }

</bundles_post_ra>
